<compile_context>
chip_gen: v7x
topology: tpu7x:2x2x1
jax: 0.10.0
libtpu: 0.0.40
codegen_flags: <defaults>
</compile_context>

<pallas_src>
import numpy as np
import jax
import jax.numpy as jnp
from jax import lax
from jax.experimental import pallas as pl
from jax.experimental.pallas import tpu as pltpu


NEG_SLOPE = 0.02
BN_EPS = 1e-5


# ----------------------------------------------------------------------------
# Fused residual-block kernel
# ----------------------------------------------------------------------------
def _make_resblock_kernel(H, W, C):
    """One grid step = one image: conv1+BN+LReLU -> conv2+BN -> +x -> LReLU."""
    M = H * W                      # flattened spatial size (lane dim)
    P = (H + 2) * W + 2            # padded lane extent (top/bottom halo+guards)
    BASE = W + 1                   # padded index of image pixel (0, 0)

    def leaky(v):
        return jnp.where(v >= 0, v, v * NEG_SLOPE)

    def kernel(x_ref, w1_ref, w2_ref, bias_ref, out_ref, pad_ref):
        # x_ref: (1, C, M) f32 — one image, channels on sublanes, H*W on lanes.

        # Column masks cancel row-wraparound reads of width-shifted taps.
        j_idx = lax.broadcasted_iota(jnp.int32, (1, M), 1) % W
        keep_l = j_idx > 0            # valid output cols for kw == 0 (dj = -1)
        keep_r = j_idx < (W - 1)      # valid output cols for kw == 2 (dj = +1)

        def conv3x3(w_ref, bias):
            # 3x3 conv as 9 shifted bf16 matmuls, bias-initialized f32 acc.
            acc = jnp.broadcast_to(bias, (C, M)).astype(jnp.float32)
            for kh in range(3):
                for kw in range(3):
                    s = kh * W + kw                       # flat tap offset
                    slab = pad_ref[:, s:s + M]            # (C, M) bf16
                    if kw == 0:
                        slab = jnp.where(keep_l, slab, jnp.zeros_like(slab))
                    elif kw == 2:
                        slab = jnp.where(keep_r, slab, jnp.zeros_like(slab))
                    acc = acc + jnp.dot(w_ref[kh * 3 + kw], slab,
                                        preferred_element_type=jnp.float32)
            return acc

        # Zero halo + guards once; the interior is fully overwritten below, so
        # the halos stay zero for both convolutions.
        pad_ref[...] = jnp.zeros_like(pad_ref)

        # ---- conv1 -> BN1 (scale folded into weights, bias here) -> LReLU ---
        pad_ref[:, BASE:BASE + M] = x_ref[0].astype(jnp.bfloat16)
        h = leaky(conv3x3(w1_ref, bias_ref[0]))

        # ---- conv2 -> BN2 -> + residual -> LReLU (reuse same pad scratch) ---
        pad_ref[:, BASE:BASE + M] = h.astype(jnp.bfloat16)
        y = leaky(conv3x3(w2_ref, bias_ref[1]) + x_ref[0])

        out_ref[0] = y.astype(out_ref.dtype)

    return kernel


# ----------------------------------------------------------------------------
# Wrapper
# ----------------------------------------------------------------------------
def _fold_bn(gamma, beta, running_mean, running_var, conv_bias):
    """Fold eval-mode BatchNorm (+ conv bias) into per-channel scale / bias."""
    s = gamma / jnp.sqrt(running_var + BN_EPS)
    b = beta + (conv_bias - running_mean) * s
    return s, b


def residual_block_forward(params, x_nchw):
    """x_nchw: (B, 64, H, W) f32  ->  (B, 64, H, W) f32 (PyTorch semantics)."""
    B, C, H, W = x_nchw.shape
    M = H * W
    P = (H + 2) * W + 2

    # NCHW flattened: channels on sublanes, H*W on lanes (no transpose needed).
    x = x_nchw.reshape(B, C, M).astype(jnp.float32)

    s1, b1 = _fold_bn(*params["bn1"], params["conv1_b"])
    s2, b2 = _fold_bn(*params["bn2"], params["conv2_b"])

    def prep_w(w, scale):
        # (Cout, Cin, 3, 3) -> fold BN scale into Cout -> (9, Cout, Cin) bf16.
        w = w * scale[:, None, None, None]
        return jnp.transpose(w, (2, 3, 0, 1)).reshape(9, C, C).astype(jnp.bfloat16)

    w1 = prep_w(params["conv1_w"], s1)
    w2 = prep_w(params["conv2_w"], s2)
    bias = jnp.stack([b1, b2], 0).reshape(2, C, 1).astype(jnp.float32)

    out = pl.pallas_call(
        _make_resblock_kernel(H, W, C),
        grid=(B,),
        out_shape=jax.ShapeDtypeStruct((B, C, M), jnp.float32),
        in_specs=[
            pl.BlockSpec((1, C, M), lambda b: (b, 0, 0)),     # x (one image)
            pl.BlockSpec((9, C, C), lambda b: (0, 0, 0)),     # conv1 taps
            pl.BlockSpec((9, C, C), lambda b: (0, 0, 0)),     # conv2 taps
            pl.BlockSpec((2, C, 1), lambda b: (0, 0, 0)),     # BN biases
        ],
        out_specs=pl.BlockSpec((1, C, M), lambda b: (b, 0, 0)),
        scratch_shapes=[
            pltpu.VMEM((C, P), jnp.bfloat16),                 # shared padded act
        ],
        compiler_params=pltpu.CompilerParams(
            dimension_semantics=("parallel",)),
    )(x, w1, w2, bias)

    return out.reshape(B, C, H, W)


# ----------------------------------------------------------------------------
# Pure-JAX reference (mirrors the PyTorch module, eval-mode BN)
# ----------------------------------------------------------------------------
def residual_block_reference(params, x):
    def conv(v, w, b):
        y = lax.conv_general_dilated(
            v, w, window_strides=(1, 1), padding=((1, 1), (1, 1)),
            dimension_numbers=("NCHW", "OIHW", "NCHW"))
        return y + b[None, :, None, None]

    def bn(v, gamma, beta, rm, rv):
        inv = 1.0 / jnp.sqrt(rv + BN_EPS)
        return ((v - rm[None, :, None, None]) * (gamma * inv)[None, :, None, None]
                + beta[None, :, None, None])

    def leaky(v):
        return jnp.where(v >= 0, v, v * NEG_SLOPE)

    h = leaky(bn(conv(x, params["conv1_w"], params["conv1_b"]), *params["bn1"]))
    y = bn(conv(h, params["conv2_w"], params["conv2_b"]), *params["bn2"])
    return leaky(x + y)


# ----------------------------------------------------------------------------
if __name__ == "__main__":
    key = jax.random.PRNGKey(0)
    kx, k1, k2, k3, k4, k5, k6 = jax.random.split(key, 7)

    B, C, H, W = 2, 64, 16, 16
    x = jax.random.normal(kx, (B, C, H, W), jnp.float32)

    def init_bn(k):
        a, b, c, d = jax.random.split(k, 4)
        gamma = 1.0 + 0.1 * jax.random.normal(a, (C,), jnp.float32)
        beta = 0.1 * jax.random.normal(b, (C,), jnp.float32)
        rm = 0.1 * jax.random.normal(c, (C,), jnp.float32)
        rv = 1.0 + 0.1 * jax.random.uniform(d, (C,), jnp.float32)
        return (gamma, beta, rm, rv)

    params = {
        "conv1_w": 0.03 * jax.random.normal(k1, (C, C, 3, 3), jnp.float32),
        "conv1_b": 0.05 * jax.random.normal(k2, (C,), jnp.float32),
        "bn1": init_bn(k3),
        "conv2_w": 0.03 * jax.random.normal(k4, (C, C, 3, 3), jnp.float32),
        "conv2_b": 0.05 * jax.random.normal(k5, (C,), jnp.float32),
        "bn2": init_bn(k6),
    }

    fwd = jax.jit(residual_block_forward)
    out = jax.block_until_ready(fwd(params, x))
    assert out.shape == (B, C, H, W), out.shape
    assert bool(jnp.all(jnp.isfinite(out)))

    ref = residual_block_reference(params, x)
    np.testing.assert_allclose(np.asarray(out), np.asarray(ref),
                               rtol=5e-2, atol=5e-2)
    print("KERNEL_OK")
</pallas_src>

<mosaic_0001>
module attributes {stable_mosaic.version = 11 : i64} {
  func.func @kernel(%arg0: i32, %arg1: memref<1x64x256xf32, #tpu.memory_space<vmem>>, %arg2: memref<9x64x64xbf16, #tpu.memory_space<vmem>>, %arg3: memref<9x64x64xbf16, #tpu.memory_space<vmem>>, %arg4: memref<2x64x1xf32, #tpu.memory_space<vmem>>, %arg5: memref<1x64x256xf32, #tpu.memory_space<vmem>>, %arg6: memref<64x290xbf16, #tpu.memory_space<vmem>>) attributes {dimension_semantics = [#tpu.dimension_semantics<parallel>], iteration_bounds = array<i64: 2>, scalar_prefetch = 0 : i64, scratch_operands = 1 : i64, tpu.core_type = #tpu.core_type<tc>, window_params = [{transform_indices = @transform_0, window_bounds = array<i64: 1, 64, 256>}, {pipeline_mode = #tpu.pipeline_mode<synchronous>, transform_indices = @transform_1, window_bounds = array<i64: 9, 64, 64>}, {pipeline_mode = #tpu.pipeline_mode<synchronous>, transform_indices = @transform_2, window_bounds = array<i64: 9, 64, 64>}, {pipeline_mode = #tpu.pipeline_mode<synchronous>, transform_indices = @transform_3, window_bounds = array<i64: 2, 64, 1>}, {transform_indices = @transform_4, window_bounds = array<i64: 1, 64, 256>}]} {
    %0 = tpu.iota {dimensions = array<i32: 1>} : vector<1x256xi32>
    %c16_i32 = arith.constant 16 : i32
    %c0_i32 = arith.constant 0 : i32
    %1 = arith.cmpi eq, %c16_i32, %c0_i32 : i32
    %c1_i32 = arith.constant 1 : i32
    %2 = arith.select %1, %c1_i32, %c16_i32 : i32
    %3 = vector.broadcast %2 : i32 to vector<1x256xi32>
    %4 = arith.remsi %0, %3 : vector<1x256xi32>
    %c0_i32_0 = arith.constant 0 : i32
    %5 = vector.broadcast %c0_i32_0 : i32 to vector<1x256xi32>
    %6 = arith.cmpi ne, %4, %5 : vector<1x256xi32>
    %c0_i32_1 = arith.constant 0 : i32
    %7 = vector.broadcast %c0_i32_1 : i32 to vector<1x256xi32>
    %8 = arith.cmpi slt, %4, %7 : vector<1x256xi32>
    %c0_i32_2 = arith.constant 0 : i32
    %9 = arith.cmpi slt, %2, %c0_i32_2 : i32
    %10 = vector.broadcast %9 : i1 to vector<1x256xi1>
    %11 = vector.broadcast %10 : vector<1x256xi1> to vector<1x256xi1>
    %12 = arith.xori %8, %11 : vector<1x256xi1>
    %13 = arith.andi %12, %6 : vector<1x256xi1>
    %14 = vector.broadcast %2 : i32 to vector<1x256xi32>
    %15 = arith.addi %4, %14 : vector<1x256xi32>
    %16 = arith.select %13, %15, %4 : vector<1x256xi1>, vector<1x256xi32>
    %c0_i32_3 = arith.constant 0 : i32
    %17 = vector.broadcast %c0_i32_3 : i32 to vector<1x256xi32>
    %18 = arith.cmpi sgt, %16, %17 : vector<1x256xi32>
    %c15_i32 = arith.constant 15 : i32
    %19 = vector.broadcast %c15_i32 : i32 to vector<1x256xi32>
    %20 = arith.cmpi slt, %16, %19 : vector<1x256xi32>
    %cst = arith.constant 0.000000e+00 : bf16
    %21 = vector.broadcast %cst : bf16 to vector<64x290xbf16>
    %c0 = arith.constant 0 : index
    %c0_4 = arith.constant 0 : index
    %22 = vector.load %arg6[%c0, %c0_4] : memref<64x290xbf16, #tpu.memory_space<vmem>>, vector<64x290xbf16>
    tpu.vector_store %arg6[%c0, %c0_4], %21 {strides = array<i32>} : memref<64x290xbf16, #tpu.memory_space<vmem>>, vector<64x290xbf16>,
    %c0_5 = arith.constant 0 : index
    %c0_6 = arith.constant 0 : index
    %c0_7 = arith.constant 0 : index
    %23 = vector.load %arg1[%c0_5, %c0_6, %c0_7] : memref<1x64x256xf32, #tpu.memory_space<vmem>>, vector<1x64x256xf32>
    %24 = vector.shape_cast %23 : vector<1x64x256xf32> to vector<64x256xf32>
    %25 = arith.truncf %24 : vector<64x256xf32> to vector<64x256xbf16>
    %c0_8 = arith.constant 0 : index
    %c17 = arith.constant 17 : index
    %26 = vector.load %arg6[%c0_8, %c17] : memref<64x290xbf16, #tpu.memory_space<vmem>>, vector<64x256xbf16>
    tpu.vector_store %arg6[%c0_8, %c17], %25 {strides = array<i32>} : memref<64x290xbf16, #tpu.memory_space<vmem>>, vector<64x256xbf16>,
    %c0_9 = arith.constant 0 : index
    %c0_10 = arith.constant 0 : index
    %c0_11 = arith.constant 0 : index
    %27 = vector.load %arg4[%c0_9, %c0_10, %c0_11] : memref<2x64x1xf32, #tpu.memory_space<vmem>>, vector<1x64x1xf32>
    %28 = vector.shape_cast %27 : vector<1x64x1xf32> to vector<64x1xf32>
    %29 = vector.shape_cast %28 : vector<64x1xf32> to vector<64x1xf32>
    %30 = vector.broadcast %29 : vector<64x1xf32> to vector<64x256xf32>
    %c0_12 = arith.constant 0 : index
    %c0_13 = arith.constant 0 : index
    %31 = vector.load %arg6[%c0_12, %c0_13] : memref<64x290xbf16, #tpu.memory_space<vmem>>, vector<64x256xbf16>
    %cst_14 = arith.constant 0.000000e+00 : bf16
    %32 = vector.broadcast %cst_14 : bf16 to vector<64x256xbf16>
    %33 = vector.shape_cast %18 : vector<1x256xi1> to vector<1x256xi1>
    %34 = vector.broadcast %33 : vector<1x256xi1> to vector<64x256xi1>
    %35 = arith.select %34, %31, %32 : vector<64x256xi1>, vector<64x256xbf16>
    %c0_15 = arith.constant 0 : index
    %c0_16 = arith.constant 0 : index
    %c0_17 = arith.constant 0 : index
    %36 = vector.load %arg2[%c0_15, %c0_16, %c0_17] : memref<9x64x64xbf16, #tpu.memory_space<vmem>>, vector<1x64x64xbf16>
    %37 = vector.shape_cast %36 : vector<1x64x64xbf16> to vector<64x64xbf16>
    %cst_18 = arith.constant dense<0.000000e+00> : vector<64x256xf32>
    %38 = tpu.matmul %37, %35, %cst_18 {dimension_numbers = #tpu.dot_dimension_numbers<[1], [0], [0], [1], [0, 0, 1, 1], [], []>} : vector<64x64xbf16>, vector<64x256xbf16>, vector<64x256xf32> -> vector<64x256xf32>
    %39 = arith.addf %30, %38 : vector<64x256xf32>
    %c0_19 = arith.constant 0 : index
    %c1 = arith.constant 1 : index
    %40 = vector.load %arg6[%c0_19, %c1] : memref<64x290xbf16, #tpu.memory_space<vmem>>, vector<64x256xbf16>
    %c1_20 = arith.constant 1 : index
    %c0_21 = arith.constant 0 : index
    %c0_22 = arith.constant 0 : index
    %41 = vector.load %arg2[%c1_20, %c0_21, %c0_22] : memref<9x64x64xbf16, #tpu.memory_space<vmem>>, vector<1x64x64xbf16>
    %42 = vector.shape_cast %41 : vector<1x64x64xbf16> to vector<64x64xbf16>
    %cst_23 = arith.constant dense<0.000000e+00> : vector<64x256xf32>
    %43 = tpu.matmul %42, %40, %cst_23 {dimension_numbers = #tpu.dot_dimension_numbers<[1], [0], [0], [1], [0, 0, 1, 1], [], []>} : vector<64x64xbf16>, vector<64x256xbf16>, vector<64x256xf32> -> vector<64x256xf32>
    %44 = arith.addf %39, %43 : vector<64x256xf32>
    %c0_24 = arith.constant 0 : index
    %c2 = arith.constant 2 : index
    %45 = vector.load %arg6[%c0_24, %c2] : memref<64x290xbf16, #tpu.memory_space<vmem>>, vector<64x256xbf16>
    %cst_25 = arith.constant 0.000000e+00 : bf16
    %46 = vector.broadcast %cst_25 : bf16 to vector<64x256xbf16>
    %47 = vector.shape_cast %20 : vector<1x256xi1> to vector<1x256xi1>
    %48 = vector.broadcast %47 : vector<1x256xi1> to vector<64x256xi1>
    %49 = arith.select %48, %45, %46 : vector<64x256xi1>, vector<64x256xbf16>
    %c2_26 = arith.constant 2 : index
    %c0_27 = arith.constant 0 : index
    %c0_28 = arith.constant 0 : index
    %50 = vector.load %arg2[%c2_26, %c0_27, %c0_28] : memref<9x64x64xbf16, #tpu.memory_space<vmem>>, vector<1x64x64xbf16>
    %51 = vector.shape_cast %50 : vector<1x64x64xbf16> to vector<64x64xbf16>
    %cst_29 = arith.constant dense<0.000000e+00> : vector<64x256xf32>
    %52 = tpu.matmul %51, %49, %cst_29 {dimension_numbers = #tpu.dot_dimension_numbers<[1], [0], [0], [1], [0, 0, 1, 1], [], []>} : vector<64x64xbf16>, vector<64x256xbf16>, vector<64x256xf32> -> vector<64x256xf32>
    %53 = arith.addf %44, %52 : vector<64x256xf32>
    %c0_30 = arith.constant 0 : index
    %c16 = arith.constant 16 : index
    %54 = vector.load %arg6[%c0_30, %c16] : memref<64x290xbf16, #tpu.memory_space<vmem>>, vector<64x256xbf16>
    %cst_31 = arith.constant 0.000000e+00 : bf16
    %55 = vector.broadcast %cst_31 : bf16 to vector<64x256xbf16>
    %56 = vector.shape_cast %18 : vector<1x256xi1> to vector<1x256xi1>
    %57 = vector.broadcast %56 : vector<1x256xi1> to vector<64x256xi1>
    %58 = arith.select %57, %54, %55 : vector<64x256xi1>, vector<64x256xbf16>
    %c3 = arith.constant 3 : index
    %c0_32 = arith.constant 0 : index
    %c0_33 = arith.constant 0 : index
    %59 = vector.load %arg2[%c3, %c0_32, %c0_33] : memref<9x64x64xbf16, #tpu.memory_space<vmem>>, vector<1x64x64xbf16>
    %60 = vector.shape_cast %59 : vector<1x64x64xbf16> to vector<64x64xbf16>
    %cst_34 = arith.constant dense<0.000000e+00> : vector<64x256xf32>
    %61 = tpu.matmul %60, %58, %cst_34 {dimension_numbers = #tpu.dot_dimension_numbers<[1], [0], [0], [1], [0, 0, 1, 1], [], []>} : vector<64x64xbf16>, vector<64x256xbf16>, vector<64x256xf32> -> vector<64x256xf32>
    %62 = arith.addf %53, %61 : vector<64x256xf32>
    %c0_35 = arith.constant 0 : index
    %c17_36 = arith.constant 17 : index
    %63 = vector.load %arg6[%c0_35, %c17_36] : memref<64x290xbf16, #tpu.memory_space<vmem>>, vector<64x256xbf16>
    %c4 = arith.constant 4 : index
    %c0_37 = arith.constant 0 : index
    %c0_38 = arith.constant 0 : index
    %64 = vector.load %arg2[%c4, %c0_37, %c0_38] : memref<9x64x64xbf16, #tpu.memory_space<vmem>>, vector<1x64x64xbf16>
    %65 = vector.shape_cast %64 : vector<1x64x64xbf16> to vector<64x64xbf16>
    %cst_39 = arith.constant dense<0.000000e+00> : vector<64x256xf32>
    %66 = tpu.matmul %65, %63, %cst_39 {dimension_numbers = #tpu.dot_dimension_numbers<[1], [0], [0], [1], [0, 0, 1, 1], [], []>} : vector<64x64xbf16>, vector<64x256xbf16>, vector<64x256xf32> -> vector<64x256xf32>
    %67 = arith.addf %62, %66 : vector<64x256xf32>
    %c0_40 = arith.constant 0 : index
    %c18 = arith.constant 18 : index
    %68 = vector.load %arg6[%c0_40, %c18] : memref<64x290xbf16, #tpu.memory_space<vmem>>, vector<64x256xbf16>
    %cst_41 = arith.constant 0.000000e+00 : bf16
    %69 = vector.broadcast %cst_41 : bf16 to vector<64x256xbf16>
    %70 = vector.shape_cast %20 : vector<1x256xi1> to vector<1x256xi1>
    %71 = vector.broadcast %70 : vector<1x256xi1> to vector<64x256xi1>
    %72 = arith.select %71, %68, %69 : vector<64x256xi1>, vector<64x256xbf16>
    %c5 = arith.constant 5 : index
    %c0_42 = arith.constant 0 : index
    %c0_43 = arith.constant 0 : index
    %73 = vector.load %arg2[%c5, %c0_42, %c0_43] : memref<9x64x64xbf16, #tpu.memory_space<vmem>>, vector<1x64x64xbf16>
    %74 = vector.shape_cast %73 : vector<1x64x64xbf16> to vector<64x64xbf16>
    %cst_44 = arith.constant dense<0.000000e+00> : vector<64x256xf32>
    %75 = tpu.matmul %74, %72, %cst_44 {dimension_numbers = #tpu.dot_dimension_numbers<[1], [0], [0], [1], [0, 0, 1, 1], [], []>} : vector<64x64xbf16>, vector<64x256xbf16>, vector<64x256xf32> -> vector<64x256xf32>
    %76 = arith.addf %67, %75 : vector<64x256xf32>
    %c0_45 = arith.constant 0 : index
    %c32 = arith.constant 32 : index
    %77 = vector.load %arg6[%c0_45, %c32] : memref<64x290xbf16, #tpu.memory_space<vmem>>, vector<64x256xbf16>
    %cst_46 = arith.constant 0.000000e+00 : bf16
    %78 = vector.broadcast %cst_46 : bf16 to vector<64x256xbf16>
    %79 = vector.shape_cast %18 : vector<1x256xi1> to vector<1x256xi1>
    %80 = vector.broadcast %79 : vector<1x256xi1> to vector<64x256xi1>
    %81 = arith.select %80, %77, %78 : vector<64x256xi1>, vector<64x256xbf16>
    %c6 = arith.constant 6 : index
    %c0_47 = arith.constant 0 : index
    %c0_48 = arith.constant 0 : index
    %82 = vector.load %arg2[%c6, %c0_47, %c0_48] : memref<9x64x64xbf16, #tpu.memory_space<vmem>>, vector<1x64x64xbf16>
    %83 = vector.shape_cast %82 : vector<1x64x64xbf16> to vector<64x64xbf16>
    %cst_49 = arith.constant dense<0.000000e+00> : vector<64x256xf32>
    %84 = tpu.matmul %83, %81, %cst_49 {dimension_numbers = #tpu.dot_dimension_numbers<[1], [0], [0], [1], [0, 0, 1, 1], [], []>} : vector<64x64xbf16>, vector<64x256xbf16>, vector<64x256xf32> -> vector<64x256xf32>
    %85 = arith.addf %76, %84 : vector<64x256xf32>
    %c0_50 = arith.constant 0 : index
    %c33 = arith.constant 33 : index
    %86 = vector.load %arg6[%c0_50, %c33] : memref<64x290xbf16, #tpu.memory_space<vmem>>, vector<64x256xbf16>
    %c7 = arith.constant 7 : index
    %c0_51 = arith.constant 0 : index
    %c0_52 = arith.constant 0 : index
    %87 = vector.load %arg2[%c7, %c0_51, %c0_52] : memref<9x64x64xbf16, #tpu.memory_space<vmem>>, vector<1x64x64xbf16>
    %88 = vector.shape_cast %87 : vector<1x64x64xbf16> to vector<64x64xbf16>
    %cst_53 = arith.constant dense<0.000000e+00> : vector<64x256xf32>
    %89 = tpu.matmul %88, %86, %cst_53 {dimension_numbers = #tpu.dot_dimension_numbers<[1], [0], [0], [1], [0, 0, 1, 1], [], []>} : vector<64x64xbf16>, vector<64x256xbf16>, vector<64x256xf32> -> vector<64x256xf32>
    %90 = arith.addf %85, %89 : vector<64x256xf32>
    %c0_54 = arith.constant 0 : index
    %c34 = arith.constant 34 : index
    %91 = vector.load %arg6[%c0_54, %c34] : memref<64x290xbf16, #tpu.memory_space<vmem>>, vector<64x256xbf16>
    %cst_55 = arith.constant 0.000000e+00 : bf16
    %92 = vector.broadcast %cst_55 : bf16 to vector<64x256xbf16>
    %93 = vector.shape_cast %20 : vector<1x256xi1> to vector<1x256xi1>
    %94 = vector.broadcast %93 : vector<1x256xi1> to vector<64x256xi1>
    %95 = arith.select %94, %91, %92 : vector<64x256xi1>, vector<64x256xbf16>
    %c8 = arith.constant 8 : index
    %c0_56 = arith.constant 0 : index
    %c0_57 = arith.constant 0 : index
    %96 = vector.load %arg2[%c8, %c0_56, %c0_57] : memref<9x64x64xbf16, #tpu.memory_space<vmem>>, vector<1x64x64xbf16>
    %97 = vector.shape_cast %96 : vector<1x64x64xbf16> to vector<64x64xbf16>
    %cst_58 = arith.constant dense<0.000000e+00> : vector<64x256xf32>
    %98 = tpu.matmul %97, %95, %cst_58 {dimension_numbers = #tpu.dot_dimension_numbers<[1], [0], [0], [1], [0, 0, 1, 1], [], []>} : vector<64x64xbf16>, vector<64x256xbf16>, vector<64x256xf32> -> vector<64x256xf32>
    %99 = arith.addf %90, %98 : vector<64x256xf32>
    %cst_59 = arith.constant 0.000000e+00 : f32
    %100 = vector.broadcast %cst_59 : f32 to vector<64x256xf32>
    %101 = arith.cmpf oge, %99, %100 : vector<64x256xf32>
    %cst_60 = arith.constant 2.000000e-02 : f32
    %102 = vector.broadcast %cst_60 : f32 to vector<64x256xf32>
    %103 = arith.mulf %99, %102 : vector<64x256xf32>
    %104 = arith.select %101, %99, %103 : vector<64x256xi1>, vector<64x256xf32>
    %105 = arith.truncf %104 : vector<64x256xf32> to vector<64x256xbf16>
    %c0_61 = arith.constant 0 : index
    %c17_62 = arith.constant 17 : index
    %106 = vector.load %arg6[%c0_61, %c17_62] : memref<64x290xbf16, #tpu.memory_space<vmem>>, vector<64x256xbf16>
    tpu.vector_store %arg6[%c0_61, %c17_62], %105 {strides = array<i32>} : memref<64x290xbf16, #tpu.memory_space<vmem>>, vector<64x256xbf16>,
    %c1_63 = arith.constant 1 : index
    %c0_64 = arith.constant 0 : index
    %c0_65 = arith.constant 0 : index
    %107 = vector.load %arg4[%c1_63, %c0_64, %c0_65] : memref<2x64x1xf32, #tpu.memory_space<vmem>>, vector<1x64x1xf32>
    %108 = vector.shape_cast %107 : vector<1x64x1xf32> to vector<64x1xf32>
    %109 = vector.shape_cast %108 : vector<64x1xf32> to vector<64x1xf32>
    %110 = vector.broadcast %109 : vector<64x1xf32> to vector<64x256xf32>
    %c0_66 = arith.constant 0 : index
    %c0_67 = arith.constant 0 : index
    %111 = vector.load %arg6[%c0_66, %c0_67] : memref<64x290xbf16, #tpu.memory_space<vmem>>, vector<64x256xbf16>
    %cst_68 = arith.constant 0.000000e+00 : bf16
    %112 = vector.broadcast %cst_68 : bf16 to vector<64x256xbf16>
    %113 = vector.shape_cast %18 : vector<1x256xi1> to vector<1x256xi1>
    %114 = vector.broadcast %113 : vector<1x256xi1> to vector<64x256xi1>
    %115 = arith.select %114, %111, %112 : vector<64x256xi1>, vector<64x256xbf16>
    %c0_69 = arith.constant 0 : index
    %c0_70 = arith.constant 0 : index
    %c0_71 = arith.constant 0 : index
    %116 = vector.load %arg3[%c0_69, %c0_70, %c0_71] : memref<9x64x64xbf16, #tpu.memory_space<vmem>>, vector<1x64x64xbf16>
    %117 = vector.shape_cast %116 : vector<1x64x64xbf16> to vector<64x64xbf16>
    %cst_72 = arith.constant dense<0.000000e+00> : vector<64x256xf32>
    %118 = tpu.matmul %117, %115, %cst_72 {dimension_numbers = #tpu.dot_dimension_numbers<[1], [0], [0], [1], [0, 0, 1, 1], [], []>} : vector<64x64xbf16>, vector<64x256xbf16>, vector<64x256xf32> -> vector<64x256xf32>
    %119 = arith.addf %110, %118 : vector<64x256xf32>
    %c0_73 = arith.constant 0 : index
    %c1_74 = arith.constant 1 : index
    %120 = vector.load %arg6[%c0_73, %c1_74] : memref<64x290xbf16, #tpu.memory_space<vmem>>, vector<64x256xbf16>
    %c1_75 = arith.constant 1 : index
    %c0_76 = arith.constant 0 : index
    %c0_77 = arith.constant 0 : index
    %121 = vector.load %arg3[%c1_75, %c0_76, %c0_77] : memref<9x64x64xbf16, #tpu.memory_space<vmem>>, vector<1x64x64xbf16>
    %122 = vector.shape_cast %121 : vector<1x64x64xbf16> to vector<64x64xbf16>
    %cst_78 = arith.constant dense<0.000000e+00> : vector<64x256xf32>
    %123 = tpu.matmul %122, %120, %cst_78 {dimension_numbers = #tpu.dot_dimension_numbers<[1], [0], [0], [1], [0, 0, 1, 1], [], []>} : vector<64x64xbf16>, vector<64x256xbf16>, vector<64x256xf32> -> vector<64x256xf32>
    %124 = arith.addf %119, %123 : vector<64x256xf32>
    %c0_79 = arith.constant 0 : index
    %c2_80 = arith.constant 2 : index
    %125 = vector.load %arg6[%c0_79, %c2_80] : memref<64x290xbf16, #tpu.memory_space<vmem>>, vector<64x256xbf16>
    %cst_81 = arith.constant 0.000000e+00 : bf16
    %126 = vector.broadcast %cst_81 : bf16 to vector<64x256xbf16>
    %127 = vector.shape_cast %20 : vector<1x256xi1> to vector<1x256xi1>
    %128 = vector.broadcast %127 : vector<1x256xi1> to vector<64x256xi1>
    %129 = arith.select %128, %125, %126 : vector<64x256xi1>, vector<64x256xbf16>
    %c2_82 = arith.constant 2 : index
    %c0_83 = arith.constant 0 : index
    %c0_84 = arith.constant 0 : index
    %130 = vector.load %arg3[%c2_82, %c0_83, %c0_84] : memref<9x64x64xbf16, #tpu.memory_space<vmem>>, vector<1x64x64xbf16>
    %131 = vector.shape_cast %130 : vector<1x64x64xbf16> to vector<64x64xbf16>
    %cst_85 = arith.constant dense<0.000000e+00> : vector<64x256xf32>
    %132 = tpu.matmul %131, %129, %cst_85 {dimension_numbers = #tpu.dot_dimension_numbers<[1], [0], [0], [1], [0, 0, 1, 1], [], []>} : vector<64x64xbf16>, vector<64x256xbf16>, vector<64x256xf32> -> vector<64x256xf32>
    %133 = arith.addf %124, %132 : vector<64x256xf32>
    %c0_86 = arith.constant 0 : index
    %c16_87 = arith.constant 16 : index
    %134 = vector.load %arg6[%c0_86, %c16_87] : memref<64x290xbf16, #tpu.memory_space<vmem>>, vector<64x256xbf16>
    %cst_88 = arith.constant 0.000000e+00 : bf16
    %135 = vector.broadcast %cst_88 : bf16 to vector<64x256xbf16>
    %136 = vector.shape_cast %18 : vector<1x256xi1> to vector<1x256xi1>
    %137 = vector.broadcast %136 : vector<1x256xi1> to vector<64x256xi1>
    %138 = arith.select %137, %134, %135 : vector<64x256xi1>, vector<64x256xbf16>
    %c3_89 = arith.constant 3 : index
    %c0_90 = arith.constant 0 : index
    %c0_91 = arith.constant 0 : index
    %139 = vector.load %arg3[%c3_89, %c0_90, %c0_91] : memref<9x64x64xbf16, #tpu.memory_space<vmem>>, vector<1x64x64xbf16>
    %140 = vector.shape_cast %139 : vector<1x64x64xbf16> to vector<64x64xbf16>
    %cst_92 = arith.constant dense<0.000000e+00> : vector<64x256xf32>
    %141 = tpu.matmul %140, %138, %cst_92 {dimension_numbers = #tpu.dot_dimension_numbers<[1], [0], [0], [1], [0, 0, 1, 1], [], []>} : vector<64x64xbf16>, vector<64x256xbf16>, vector<64x256xf32> -> vector<64x256xf32>
    %142 = arith.addf %133, %141 : vector<64x256xf32>
    %c0_93 = arith.constant 0 : index
    %c17_94 = arith.constant 17 : index
    %143 = vector.load %arg6[%c0_93, %c17_94] : memref<64x290xbf16, #tpu.memory_space<vmem>>, vector<64x256xbf16>
    %c4_95 = arith.constant 4 : index
    %c0_96 = arith.constant 0 : index
    %c0_97 = arith.constant 0 : index
    %144 = vector.load %arg3[%c4_95, %c0_96, %c0_97] : memref<9x64x64xbf16, #tpu.memory_space<vmem>>, vector<1x64x64xbf16>
    %145 = vector.shape_cast %144 : vector<1x64x64xbf16> to vector<64x64xbf16>
    %cst_98 = arith.constant dense<0.000000e+00> : vector<64x256xf32>
    %146 = tpu.matmul %145, %143, %cst_98 {dimension_numbers = #tpu.dot_dimension_numbers<[1], [0], [0], [1], [0, 0, 1, 1], [], []>} : vector<64x64xbf16>, vector<64x256xbf16>, vector<64x256xf32> -> vector<64x256xf32>
    %147 = arith.addf %142, %146 : vector<64x256xf32>
    %c0_99 = arith.constant 0 : index
    %c18_100 = arith.constant 18 : index
    %148 = vector.load %arg6[%c0_99, %c18_100] : memref<64x290xbf16, #tpu.memory_space<vmem>>, vector<64x256xbf16>
    %cst_101 = arith.constant 0.000000e+00 : bf16
    %149 = vector.broadcast %cst_101 : bf16 to vector<64x256xbf16>
    %150 = vector.shape_cast %20 : vector<1x256xi1> to vector<1x256xi1>
    %151 = vector.broadcast %150 : vector<1x256xi1> to vector<64x256xi1>
    %152 = arith.select %151, %148, %149 : vector<64x256xi1>, vector<64x256xbf16>
    %c5_102 = arith.constant 5 : index
    %c0_103 = arith.constant 0 : index
    %c0_104 = arith.constant 0 : index
    %153 = vector.load %arg3[%c5_102, %c0_103, %c0_104] : memref<9x64x64xbf16, #tpu.memory_space<vmem>>, vector<1x64x64xbf16>
    %154 = vector.shape_cast %153 : vector<1x64x64xbf16> to vector<64x64xbf16>
    %cst_105 = arith.constant dense<0.000000e+00> : vector<64x256xf32>
    %155 = tpu.matmul %154, %152, %cst_105 {dimension_numbers = #tpu.dot_dimension_numbers<[1], [0], [0], [1], [0, 0, 1, 1], [], []>} : vector<64x64xbf16>, vector<64x256xbf16>, vector<64x256xf32> -> vector<64x256xf32>
    %156 = arith.addf %147, %155 : vector<64x256xf32>
    %c0_106 = arith.constant 0 : index
    %c32_107 = arith.constant 32 : index
    %157 = vector.load %arg6[%c0_106, %c32_107] : memref<64x290xbf16, #tpu.memory_space<vmem>>, vector<64x256xbf16>
    %cst_108 = arith.constant 0.000000e+00 : bf16
    %158 = vector.broadcast %cst_108 : bf16 to vector<64x256xbf16>
    %159 = vector.shape_cast %18 : vector<1x256xi1> to vector<1x256xi1>
    %160 = vector.broadcast %159 : vector<1x256xi1> to vector<64x256xi1>
    %161 = arith.select %160, %157, %158 : vector<64x256xi1>, vector<64x256xbf16>
    %c6_109 = arith.constant 6 : index
    %c0_110 = arith.constant 0 : index
    %c0_111 = arith.constant 0 : index
    %162 = vector.load %arg3[%c6_109, %c0_110, %c0_111] : memref<9x64x64xbf16, #tpu.memory_space<vmem>>, vector<1x64x64xbf16>
    %163 = vector.shape_cast %162 : vector<1x64x64xbf16> to vector<64x64xbf16>
    %cst_112 = arith.constant dense<0.000000e+00> : vector<64x256xf32>
    %164 = tpu.matmul %163, %161, %cst_112 {dimension_numbers = #tpu.dot_dimension_numbers<[1], [0], [0], [1], [0, 0, 1, 1], [], []>} : vector<64x64xbf16>, vector<64x256xbf16>, vector<64x256xf32> -> vector<64x256xf32>
    %165 = arith.addf %156, %164 : vector<64x256xf32>
    %c0_113 = arith.constant 0 : index
    %c33_114 = arith.constant 33 : index
    %166 = vector.load %arg6[%c0_113, %c33_114] : memref<64x290xbf16, #tpu.memory_space<vmem>>, vector<64x256xbf16>
    %c7_115 = arith.constant 7 : index
    %c0_116 = arith.constant 0 : index
    %c0_117 = arith.constant 0 : index
    %167 = vector.load %arg3[%c7_115, %c0_116, %c0_117] : memref<9x64x64xbf16, #tpu.memory_space<vmem>>, vector<1x64x64xbf16>
    %168 = vector.shape_cast %167 : vector<1x64x64xbf16> to vector<64x64xbf16>
    %cst_118 = arith.constant dense<0.000000e+00> : vector<64x256xf32>
    %169 = tpu.matmul %168, %166, %cst_118 {dimension_numbers = #tpu.dot_dimension_numbers<[1], [0], [0], [1], [0, 0, 1, 1], [], []>} : vector<64x64xbf16>, vector<64x256xbf16>, vector<64x256xf32> -> vector<64x256xf32>
    %170 = arith.addf %165, %169 : vector<64x256xf32>
    %c0_119 = arith.constant 0 : index
    %c34_120 = arith.constant 34 : index
    %171 = vector.load %arg6[%c0_119, %c34_120] : memref<64x290xbf16, #tpu.memory_space<vmem>>, vector<64x256xbf16>
    %cst_121 = arith.constant 0.000000e+00 : bf16
    %172 = vector.broadcast %cst_121 : bf16 to vector<64x256xbf16>
    %173 = vector.shape_cast %20 : vector<1x256xi1> to vector<1x256xi1>
    %174 = vector.broadcast %173 : vector<1x256xi1> to vector<64x256xi1>
    %175 = arith.select %174, %171, %172 : vector<64x256xi1>, vector<64x256xbf16>
    %c8_122 = arith.constant 8 : index
    %c0_123 = arith.constant 0 : index
    %c0_124 = arith.constant 0 : index
    %176 = vector.load %arg3[%c8_122, %c0_123, %c0_124] : memref<9x64x64xbf16, #tpu.memory_space<vmem>>, vector<1x64x64xbf16>
    %177 = vector.shape_cast %176 : vector<1x64x64xbf16> to vector<64x64xbf16>
    %cst_125 = arith.constant dense<0.000000e+00> : vector<64x256xf32>
    %178 = tpu.matmul %177, %175, %cst_125 {dimension_numbers = #tpu.dot_dimension_numbers<[1], [0], [0], [1], [0, 0, 1, 1], [], []>} : vector<64x64xbf16>, vector<64x256xbf16>, vector<64x256xf32> -> vector<64x256xf32>
    %179 = arith.addf %170, %178 : vector<64x256xf32>
    %c0_126 = arith.constant 0 : index
    %c0_127 = arith.constant 0 : index
    %c0_128 = arith.constant 0 : index
    %180 = vector.load %arg1[%c0_126, %c0_127, %c0_128] : memref<1x64x256xf32, #tpu.memory_space<vmem>>, vector<1x64x256xf32>
    %181 = vector.shape_cast %180 : vector<1x64x256xf32> to vector<64x256xf32>
    %182 = arith.addf %179, %181 : vector<64x256xf32>
    %cst_129 = arith.constant 0.000000e+00 : f32
    %183 = vector.broadcast %cst_129 : f32 to vector<64x256xf32>
    %184 = arith.cmpf oge, %182, %183 : vector<64x256xf32>
    %cst_130 = arith.constant 2.000000e-02 : f32
    %185 = vector.broadcast %cst_130 : f32 to vector<64x256xf32>
    %186 = arith.mulf %182, %185 : vector<64x256xf32>
    %187 = arith.select %184, %182, %186 : vector<64x256xi1>, vector<64x256xf32>
    %c0_131 = arith.constant 0 : index
    %c0_132 = arith.constant 0 : index
    %c0_133 = arith.constant 0 : index
    %188 = vector.load %arg5[%c0_131, %c0_132, %c0_133] : memref<1x64x256xf32, #tpu.memory_space<vmem>>, vector<1x64x256xf32>
    %189 = vector.shape_cast %188 : vector<1x64x256xf32> to vector<64x256xf32>
    %190 = vector.shape_cast %187 : vector<64x256xf32> to vector<1x64x256xf32>
    tpu.vector_store %arg5[%c0_131, %c0_132, %c0_133], %190 {strides = array<i32>} : memref<1x64x256xf32, #tpu.memory_space<vmem>>, vector<1x64x256xf32>,
    return
  }
  func.func @transform_0(%arg0: i32) -> (i32, i32, i32) {
    %c0_i32 = arith.constant 0 : i32
    %c0_i32_0 = arith.constant 0 : i32
    %c0_i32_1 = arith.constant 0 : i32
    return %arg0, %c0_i32, %c0_i32_0 : i32, i32, i32
  }
  func.func @transform_1(%arg0: i32) -> (i32, i32, i32) {
    %c0_i32 = arith.constant 0 : i32
    %c0_i32_0 = arith.constant 0 : i32
    %c0_i32_1 = arith.constant 0 : i32
    %c0_i32_2 = arith.constant 0 : i32
    return %c0_i32, %c0_i32_0, %c0_i32_1 : i32, i32, i32
  }
  func.func @transform_2(%arg0: i32) -> (i32, i32, i32) {
    %c0_i32 = arith.constant 0 : i32
    %c0_i32_0 = arith.constant 0 : i32
    %c0_i32_1 = arith.constant 0 : i32
    %c0_i32_2 = arith.constant 0 : i32
    return %c0_i32, %c0_i32_0, %c0_i32_1 : i32, i32, i32
  }
  func.func @transform_3(%arg0: i32) -> (i32, i32, i32) {
    %c0_i32 = arith.constant 0 : i32
    %c0_i32_0 = arith.constant 0 : i32
    %c0_i32_1 = arith.constant 0 : i32
    %c0_i32_2 = arith.constant 0 : i32
    return %c0_i32, %c0_i32_0, %c0_i32_1 : i32, i32, i32
  }
  func.func @transform_4(%arg0: i32) -> (i32, i32, i32) {
    %c0_i32 = arith.constant 0 : i32
    %c0_i32_0 = arith.constant 0 : i32
    %c0_i32_1 = arith.constant 0 : i32
    return %arg0, %c0_i32, %c0_i32_0 : i32, i32, i32
  }
}

</mosaic_0001>

<bundles_post_ra>
// kernel: residual_block_forward.1
= control target key start
LH: loop header
LB: loop body
LE: loop exit
PB: predicated region body
PF: predicated region fallthrough
CT: control target
= control target key end

     0   :  { %s4796_s15 = smov 0   ;;  %s6290_s0 = inlined_call_operand.vmem [shape: f32[2,64,256], index: 0, kind: input, shape index: {}]   ;;  %s6291_s1 = inlined_call_operand.vmem [shape: bf16[9,64,64], index: 1, kind: input, shape index: {}]   ;;  %s6292_s2 = inlined_call_operand.vmem [shape: bf16[9,64,64], index: 2, kind: input, shape index: {}]   ;;  %s6293_s3 = inlined_call_operand.vmem [shape: f32[2,64,1], index: 3, kind: input, shape index: {}]   ;;  %s6294_s4 = inlined_call_operand.vmem [shape: f32[2,64,256], index: 4, kind: output, shape index: {}]  }
   0x1 LB: > { %s4062_s16 = sadd.s32 4294967295, %s4754_s15   ;;  %p4066_p0 = scmp.ge.s32.totalorder %s4754_s15, 1  ;;  %s4754_s15 = sphi %s4796_s15, %s14_s15  }
   0x2   : > { %p162_p1 = scmp.lt.s32.totalorder %s4754_s15, 3 }
   0x4   : > { %p163_p2 = pnand %p4066_p0, %p162_p1 }
   0x5   : > { %p4804_p3 = scmp.lt.s32.totalorder (!%p163_p2), %s4062_s16, 1  ;;  %v201_v0 = vlaneseq (!%p163_p2)  ;;  %vm234_vm0 = vcmask (!%p163_p2), 277504   ;;  %v4756_v1 = vmov (!%p163_p2), 0   ;;  %s4757_s22 = smov (!%p163_p2), 17   ;;  %vm310_vm7 = vcmask (!%p163_p2), 1047688   ;;  %v4679_v17 = vld [vmem:[%s6291_s1 + $0x18] sm:$0xff] (!%p163_p2)  }
   0x6   : > { %166 = sbr.rel (%p163_p2) target bundleno = 1572 (0x624), region = 36  ;;  %232 = vst [vmem:[#allocation2] sm:$0xff] (!%p163_p2), %v4756_v1  ;;  %236 = vst [vmem:[#allocation2 + $0x18] sm:$0xff] (!%p163_p2), %v4756_v1  ;;  %477 = vmatprep.mubr.bf16.mxu0 (!%p163_p2), %v4756_v1  ;;  %4675 = vset.pattern.permute.xlu1 (!%p163_p2), %v4756_v1  ;;  %s4758_s23 = smov (!%p163_p2), 2   ;;  %vm293_vm8 = vcmask (!%p163_p2), 138240   ;;  %vm432_vm11 = vcmask (!%p163_p2), 523264  }
   0x7   : > { %239 = vst [vmem:[#allocation2 + $0x30] sm:$0xff] (!%p163_p2), %v4756_v1  ;;  %242 = vst [vmem:[#allocation2 + $0x48] sm:$0xff] (!%p163_p2), %v4756_v1  ;;  %v202_v2 = vand.u32 (!%p163_p2), 127, %v201_v0  ;;  %4674 = vset.pattern.permute.xlu0 (!%p163_p2), %v4756_v1  ;;  %2350 = vmatprep.mubr.bf16.mxu1 (!%p163_p2), %v4756_v1  ;;  %v387_v28 = vshrl.u32 (!%p163_p2), %v201_v0, 7  ;;  %s4759_s24 = smov (!%p163_p2), 16   ;;  %s4760_s25 = smov (!%p163_p2), 127  }
   0x8   : > { %238 = vst.msk [vmem:[#allocation2 + $0x28] sm:$0xff] (!%p163_p2), %vm234_vm0, %v4756_v1  ;;  %235 = vst.msk [vmem:[#allocation2 + $0x10] sm:$0xff] (!%p163_p2), %vm234_vm0, %v4756_v1  ;;  %vm747_vm13 = vcmask (!%p163_p2), 15360   ;;  %s4761_s30 = smov (!%p163_p2), 126   ;;  %s4762_s9 = smov (!%p163_p2), 112  }
   0x9   : > { %241 = vst.msk [vmem:[#allocation2 + $0x40] sm:$0xff] (!%p163_p2), %vm234_vm0, %v4756_v1  ;;  %244 = vst.msk [vmem:[#allocation2 + $0x58] sm:$0xff] (!%p163_p2), %vm234_vm0, %v4756_v1  ;;  %v203_v3 = vadd.s32 (!%p163_p2), 128, %v202_v2  ;;  %v208_v4 = vand.u32 (!%p163_p2), 15, %v202_v2  ;;  %v392_v33 = vsub.s32 (!%p163_p2), 4, %v387_v28  ;;  %v388_v35 = vsub.s32 (!%p163_p2), 0, %v387_v28 }
   0xa   : > { %s4763_s10 = smov (!%p163_p2), 18   ;;  %s4764_s11 = smov (!%p163_p2), 111  }
   0xb   : > { %v215_v8 = vand.u32 (!%p163_p2), 15, %v203_v3  ;;  %vm4845_vm1 = vcmp.lt.s32.totalorder (!%p163_p2), %v208_v4, 15  ;;  %vm4856_vm3 = vcmp.gt.s32.totalorder (!%p163_p2), %v208_v4, 0  ;;  %v4676_v3 = vld [vmem:[%s6291_s1] sm:$0xff] (!%p163_p2)   ;;  %s4765_s12 = smov (!%p163_p2), 32   ;;  %s4766_s27 = smov (!%p163_p2), 110  }
   0xc   : > { %s4767_s13 = smov (!%p163_p2), 96   ;;  %s4768_s19 = smov (!%p163_p2), 34  }
   0xd   : > { %s6417_s16 = smov (!%p4804_p3, %s4062_s16), 1  ;;  %vm4849_vm2 = vcmp.lt.s32.totalorder %v215_v8, 15  ;;  %vm4860_vm4 = vcmp.gt.s32.totalorder %v215_v8, 0  ;;  %s4769_s5 = smov 95  }
   0xe   : > { %s4361_s18 = sshll.u32 %s6417_s16, 7  ;;  %vm733_vm5 = vmpackc.low %vm4849_vm2, %vm4845_vm1  ;;  %s4770_s6 = smov 94  }
   0xf   : > { %s4834_s21 = scalar_lea.vmem %s6290_s0, %s4361_s18  ;;  %vm384_vm6 = vmpackc.low %vm4860_vm4, %vm4856_vm3  ;;  %v734_v34 = vsel %vm733_vm5, 65537, %v4756_v1  ;;  %vm951_vm3 = vcmask 130048   ;;  %vm6296_vm5 = vcmask 1039360   ;;  %s6257_s14 = scalar_lea.vmem %s6294_s4, %s4361_s18 }
  0x10   : > { %v249_v5 = vld [vmem:[%s4834_s21 + $0x20] sm:$0xff]  ;;  %v251_v6 = vld [vmem:[%s4834_s21 + $0x30] sm:$0xff]  ;;  %v250_v11 = vld [vmem:[%s4834_s21 + $0x28] sm:$0xff]  ;;  %v385_v36 = vsel %vm384_vm6, 65537, %v4756_v1  ;;  %v4885_v39 = vrot.slane %v734_v34, %v392_v33  ;;  %v4888_v40 = vrot.slane %v734_v34, %v388_v35  ;;  %vm6295_vm6 = vcmask 1031168  }
  0x11   : > { %v245_v7 = vld [vmem:[%s4834_s21] sm:$0xff]  ;;  %v263_v9 = vpack.c.bf16 %v251_v6, %v249_v5  ;;  %v247_v10 = vld [vmem:[%s4834_s21 + $0x10] sm:$0xff]  ;;  %v252_v12 = vld [vmem:[%s4834_s21 + $0x38] sm:$0xff]  ;;  %v4891_v41 = vrot.slane %v385_v36, %v388_v35  ;;  %v4894_v42 = vrot.slane %v385_v36, %v392_v33 }
  0x12   : > { %v261_v13 = vpack.c.bf16 %v247_v10, %v245_v7  ;;  %v246_v14 = vld [vmem:[%s4834_s21 + $0x8] sm:$0xff]  ;;  %v248_v15 = vld [vmem:[%s4834_s21 + $0x18] sm:$0xff]  ;;  %v264_v16 = vpack.c.bf16 %v252_v12, %v250_v11  ;;  %v253_v24 = vld [vmem:[%s4834_s21 + $0x40] sm:$0xff] }
  0x13   : > { %281 = vrot.lane.b32.xlu1 %v263_v9, %s4757_s22  ;;  %v262_v19 = vpack.c.bf16 %v248_v15, %v246_v14  ;;  %v254_v20 = vld [vmem:[%s4834_s21 + $0x48] sm:$0xff]  ;;  %v256_v21 = vld [vmem:[%s4834_s21 + $0x58] sm:$0xff]  ;;  %v255_v25 = vld [vmem:[%s4834_s21 + $0x50] sm:$0xff]  ;;  %vm395_vm9 = vcmp.ne.s16.totalorder %v4894_v42, 0  ;;  %vm394_vm10 = vcmp.ne.s16.totalorder %v4891_v41, 0 }
  0x14   : > { %277 = vrot.lane.b32.xlu0 %v261_v13, %s4757_s22  ;;  %v258_v26 = vld [vmem:[%s4834_s21 + $0x68] sm:$0xff]  ;;  %v260_v27 = vld [vmem:[%s4834_s21 + $0x78] sm:$0xff]  ;;  %v266_v29 = vpack.c.bf16 %v256_v21, %v254_v20  ;;  %v257_v30 = vld [vmem:[%s4834_s21 + $0x60] sm:$0xff]  ;;  %v265_v32 = vpack.c.bf16 %v255_v25, %v253_v24 }
  0x15   : > { %v259_v31 = vld [vmem:[%s4834_s21 + $0x70] sm:$0xff]  ;;  %v268_v37 = vpack.c.bf16 %v260_v27, %v258_v26  ;;  %v4677_v7 = vld [vmem:[%s6291_s1 + $0x8] sm:$0xff]  }
  0x16   : > { %v267_v38 = vpack.c.bf16 %v259_v31, %v257_v30  ;;  %v4678_v12 = vld [vmem:[%s6291_s1 + $0x10] sm:$0xff]  }
  0x17   : > { %283 = vrot.lane.b32.xlu1 %v264_v16, %s4757_s22 }
  0x18   : > { %279 = vrot.lane.b32.xlu0 %v262_v19, %s4757_s22 }
  0x1b   : > { %287 = vrot.lane.b32.xlu1 %v266_v29, %s4757_s22 }
  0x1c   : > { %285 = vrot.lane.b32.xlu0 %v265_v32, %s4757_s22 }
  0x1f   : > { %291 = vrot.lane.b32.xlu1 %v268_v37, %s4757_s22 }
  0x20   : > { %289 = vrot.lane.b32.xlu0 %v267_v38, %s4757_s22 }
  0x23   : > { %745 = vrot.lane.b32.xlu1 %v4885_v39, %s4758_s23 }
  0x24   : > { %743 = vrot.lane.b32.xlu0 %v4888_v40, %s4758_s23 }
  0x27   : > { %947 = vrot.lane.b32.xlu1 %v4891_v41, %s4759_s24 }
  0x28   : > { %949 = vrot.lane.b32.xlu0 %v4894_v42, %s4759_s24 }
  0x85   : > { %v282_v43 = vpop.permute.xlu1 %281 }
  0x86   : > { %315 = vst.msk [vmem:[#allocation2 + $0x18] sm:$0xff] %vm310_vm7, %v282_v43  ;;  %v278_v44 = vpop.permute.xlu0 %277 }
  0x87   : > { %311 = vst.msk [vmem:[#allocation2] sm:$0xff] %vm310_vm7, %v278_v44 }
  0x89   : > { %v284_v45 = vpop.permute.xlu1 %283 }
  0x8a   : > { %317 = vst.msk [vmem:[#allocation2 + $0x28] sm:$0xff] %vm293_vm8, %v284_v45  ;;  %v280_v46 = vpop.permute.xlu0 %279  ;;  %v4920_v52 = vsel %vm293_vm8, %v282_v43, %v284_v45 }
  0x8b   : > { %v4903_v47 = vsel %vm293_vm8, %v278_v44, %v280_v46  ;;  %314 = vst.msk [vmem:[#allocation2 + $0x10] sm:$0xff] %vm293_vm8, %v280_v46 }
  0x8c   : > { %4075 = vmatprep.subr.msk.bf16.mxu0 %vm395_vm9, %v4903_v47 }
  0x8d   : > { %v288_v48 = vpop.permute.xlu1 %287  ;;  %v4922_v53 = vld [vmem:[#allocation2 + $0x18] sm:$0xff] }
  0x8e   : > { %320 = vst.msk [vmem:[#allocation2 + $0x40] sm:$0xff] %vm293_vm8, %v288_v48  ;;  %v286_v49 = vpop.permute.xlu0 %285  ;;  %v4911_v50 = vld [vmem:[#allocation2] sm:$0xff]  ;;  %v398_v59 = vsel %vm394_vm10, %v4922_v53, 0 }
  0x8f   : > { %318 = vst.msk [vmem:[#allocation2 + $0x30] sm:$0xff] %vm310_vm7, %v286_v49  ;;  %587 = vrot.lane.b32.xlu0 %v4911_v50, %s4760_s25  ;;  %v396_v51 = vsel %vm394_vm10, %v4911_v50, 0  ;;  %v4930_v56 = vsel %vm293_vm8, %v286_v49, %v288_v48 }
  0x90   : > { %446 = vmatpush1.bf16.msra.mxu0 %v396_v51 }
  0x91   : > { %v292_v54 = vpop.permute.xlu1 %291  ;;  %v4924_v55 = vld [vmem:[#allocation2 + $0x28] sm:$0xff]  ;;  %4076 = vmatprep.subr.msk.bf16.mxu0 %vm395_vm9, %v4920_v52 }
  0x92   : > { %323 = vst.msk [vmem:[#allocation2 + $0x58] sm:$0xff] %vm293_vm8, %v292_v54  ;;  %v290_v57 = vpop.permute.xlu0 %289  ;;  %v4933_v58 = vld [vmem:[#allocation2 + $0x10] sm:$0xff] }
  0x93   : > { %321 = vst.msk [vmem:[#allocation2 + $0x48] sm:$0xff] %vm310_vm7, %v290_v57  ;;  %597 = vrot.lane.b32.xlu0 %v4924_v55, %s4760_s25  ;;  %591 = vrot.lane.b32.xlu1 %v4933_v58, %s4760_s25  ;;  %v4947_v60 = vsel %vm293_vm8, %v290_v57, %v292_v54 }
  0x94   : > { %448 = vmatpush1.bf16.msra.mxu0 %v398_v59 }
  0x95   : > { %4077 = vmatprep.subr.msk.bf16.mxu0 %vm395_vm9, %v4930_v56  ;;  %v4970_v2 = vld [vmem:[#allocation2 + $0x40] sm:$0xff]  ;;  %v4990_v6 = vpop.permute.xlu1 %745 }
  0x96   : > { %v4949_v61 = vld [vmem:[#allocation2 + $0x30] sm:$0xff]  ;;  %v4979_v4 = vpop.permute.xlu0 %743  ;;  %vm751_vm14 = vcmp.ne.s16.totalorder %v4990_v6, 0 }
  0x97   : > { %593 = vrot.lane.b32.xlu1 %v4922_v53, %s4760_s25  ;;  %589 = vrot.lane.b32.xlu0 %v4903_v47, %s4760_s25  ;;  %v400_v62 = vsel %vm394_vm10, %v4949_v61, 0  ;;  %vm749_vm12 = vcmp.ne.s16.totalorder %v4979_v4, 0  ;;  %v5004_v9 = vsel %vm747_vm13, %v4979_v4, %v4990_v6  ;;  %v754_v10 = vsel %vm751_vm14, %v4933_v58, 0 }
  0x98   : > { %450 = vmatpush1.bf16.msra.mxu0 %v400_v62  ;;  %v752_v8 = vsel %vm749_vm12, %v4911_v50, 0  ;;  %v757_v11 = vsel %vm751_vm14, %v4924_v55, 0  ;;  %vm750_vm15 = vcmp.ne.s16.totalorder %v5004_v9, 0  ;;  %v755_v13 = vsel %vm749_vm12, %v4922_v53, 0 }
  0x99   : > { %4078 = vmatprep.subr.msk.bf16.mxu0 %vm395_vm9, %v4947_v60  ;;  %v4981_v5 = vld [vmem:[#allocation2 + $0x58] sm:$0xff]  ;;  %v753_v14 = vsel %vm750_vm15, %v4903_v47, 0  ;;  %v756_v15 = vsel %vm750_vm15, %v4920_v52, 0  ;;  %v758_v16 = vsel %vm749_vm12, %v4949_v61, 0  ;;  %v760_v18 = vsel %vm751_vm14, %v4970_v2, 0  ;;  %v5049_v20 = vpop.permute.xlu1 %947 }
  0x9a   : > { %v4961_v63 = vld [vmem:[#allocation2 + $0x48] sm:$0xff]  ;;  %v759_v19 = vsel %vm750_vm15, %v4930_v56, 0  ;;  %v762_v21 = vsel %vm750_vm15, %v4947_v60, 0  ;;  %v763_v22 = vsel %vm751_vm14, %v4981_v5, 0  ;;  %vm6297_vm1 = vcmp.ne.s16.totalorder %v5049_v20, 0  ;;  %v5062_v23 = vpop.permute.xlu0 %949 }
  0x9b   : > { %595 = vrot.lane.b32.xlu1 %v4920_v52, %s4760_s25  ;;  %599 = vrot.lane.b32.xlu0 %v4949_v61, %s4760_s25  ;;  %v402_v0 = vsel %vm394_vm10, %v4961_v63, 0  ;;  %v761_v24 = vsel %vm749_vm12, %v4961_v63, 0  ;;  %v956_v25 = vsel %vm6297_vm1, %v4911_v50, 0  ;;  %vm955_vm2 = vcmp.ne.s16.totalorder %v5062_v23, 0 }
  0x9c   : > { %452 = vmatpush1.bf16.msra.mxu0 %v402_v0  ;;  %v958_v26 = vsel %vm955_vm2, %v4933_v58, 0  ;;  %v5080_v27 = vsel %vm951_vm3, %v5049_v20, %v5062_v23  ;;  %v961_v28 = vsel %vm955_vm2, %v4924_v55, 0  ;;  %v959_v29 = vsel %vm6297_vm1, %v4922_v53, 0 }
  0x9d   : > { %vm954_vm4 = vcmp.ne.s16.totalorder %v5080_v27, 0  ;;  %v962_v32 = vsel %vm6297_vm1, %v4949_v61, 0  ;;  %v964_v33 = vsel %vm955_vm2, %v4970_v2, 0  ;;  %v967_v36 = vsel %vm955_vm2, %v4981_v5, 0 }
  0x9e   : > { %v957_v30 = vsel %vm954_vm4, %v4903_v47, 0  ;;  %v960_v31 = vsel %vm954_vm4, %v4920_v52, 0  ;;  %v963_v34 = vsel %vm954_vm4, %v4930_v56, 0  ;;  %v966_v35 = vsel %vm954_vm4, %v4947_v60, 0 }
  0x9f   : > { %603 = vrot.lane.b32.xlu1 %v4970_v2, %s4760_s25  ;;  %601 = vrot.lane.b32.xlu0 %v4930_v56, %s4760_s25  ;;  %v965_v37 = vsel %vm6297_vm1, %v4961_v63, 0  ;;  %vm1326_vm3 = vcmask 146432   ;;  %vm6298_vm1 = vcmask 916480  }
  0xa0   : > { %4079 = vmatmul.mubr.msk.bf16.vlgmr.msra.gmra.mrb[0].mxu0 %vm432_vm11, %v4676_v3 }
  0xa1   : > { %487 = vmatprep.mubr.bf16.mxu0 %v4756_v1 }
  0xa3   : > { %609 = vrot.lane.b32.xlu0 %v4981_v5, %s4760_s25  ;;  %607 = vrot.lane.b32.xlu1 %v4947_v60, %s4760_s25 }
  0xa7   : > { %605 = vrot.lane.b32.xlu1 %v4961_v63, %s4760_s25  ;;  %805 = vrot.lane.b32.xlu0 %v752_v8, %s4761_s30 }
  0xa8   : > { %4080 = vmatmul.mubr.msk.bf16.gmra.mrb[4].mxu0 %vm432_vm11, %v4677_v7 }
  0xa9   : > { %497 = vmatprep.mubr.bf16.mxu0 %v4756_v1 }
  0xab   : > { %809 = vrot.lane.b32.xlu1 %v754_v10, %s4761_s30  ;;  %815 = vrot.lane.b32.xlu0 %v757_v11, %s4761_s30 }
  0xaf   : > { %811 = vrot.lane.b32.xlu1 %v755_v13, %s4761_s30  ;;  %807 = vrot.lane.b32.xlu0 %v753_v14, %s4761_s30 }
  0xb0   : > { %4081 = vmatmul.mubr.msk.bf16.gmra.mrb[8].mxu0 %vm432_vm11, %v4678_v12 }
  0xb1   : > { %507 = vmatprep.mubr.bf16.mxu0 %v4756_v1 }
  0xb3   : > { %813 = vrot.lane.b32.xlu1 %v756_v15, %s4761_s30  ;;  %817 = vrot.lane.b32.xlu0 %v758_v16, %s4761_s30  ;;  %v4680_v15 = vld [vmem:[%s6291_s1 + $0x20] sm:$0xff]  }
  0xb7   : > { %821 = vrot.lane.b32.xlu1 %v760_v18, %s4761_s30  ;;  %819 = vrot.lane.b32.xlu0 %v759_v19, %s4761_s30 }
  0xb8   : > { %4082 = vmatmul.mubr.msk.bf16.gmra.mrb[12].mxu0 %vm432_vm11, %v4679_v17 }
  0xb9   : > { %672 = vmatprep.mubr.bf16.mxu0 %v4756_v1 }
  0xbb   : > { %825 = vrot.lane.b32.xlu1 %v762_v21, %s4761_s30  ;;  %827 = vrot.lane.b32.xlu0 %v763_v22, %s4761_s30 }
  0xbf   : > { %823 = vrot.lane.b32.xlu1 %v761_v24, %s4761_s30  ;;  %1009 = vrot.lane.b32.xlu0 %v956_v25, %s4762_s9  ;;  %v4681_v24 = vld [vmem:[%s6291_s1 + $0x28] sm:$0xff]  }
  0xc3   : > { %1324 = vrot.lane.b32.xlu0 %v4885_v39, %s4763_s10  ;;  %1013 = vrot.lane.b32.xlu1 %v958_v26, %s4762_s9 }
  0xc7   : > { %1019 = vrot.lane.b32.xlu0 %v961_v28, %s4762_s9  ;;  %1322 = vrot.lane.b32.xlu1 %v4888_v40, %s4763_s10 }
  0xcb   : > { %1015 = vrot.lane.b32.xlu1 %v959_v29, %s4762_s9  ;;  %1011 = vrot.lane.b32.xlu0 %v957_v30, %s4762_s9 }
  0xcf   : > { %1017 = vrot.lane.b32.xlu1 %v960_v31, %s4762_s9  ;;  %1021 = vrot.lane.b32.xlu0 %v962_v32, %s4762_s9 }
  0xd3   : > { %1025 = vrot.lane.b32.xlu1 %v964_v33, %s4762_s9  ;;  %1023 = vrot.lane.b32.xlu0 %v963_v34, %s4762_s9  ;;  %v4682_v34 = vld [vmem:[%s6291_s1 + $0x30] sm:$0xff]  }
  0xd7   : > { %1029 = vrot.lane.b32.xlu1 %v966_v35, %s4762_s9  ;;  %1031 = vrot.lane.b32.xlu0 %v967_v36, %s4762_s9 }
  0xdb   : > { %1027 = vrot.lane.b32.xlu1 %v965_v37, %s4762_s9  ;;  %1182 = vrot.lane.b32.xlu0 %v4903_v47, %s4764_s11 }
  0xdf   : > { %1184 = vrot.lane.b32.xlu1 %v4933_v58, %s4764_s11  ;;  %1180 = vrot.lane.b32.xlu0 %v4911_v50, %s4764_s11 }
  0xe3   : > { %1526 = vrot.lane.b32.xlu1 %v4891_v41, %s4765_s12  ;;  %1528 = vrot.lane.b32.xlu0 %v4894_v42, %s4765_s12 }
  0xe7   : > { %1188 = vrot.lane.b32.xlu1 %v4920_v52, %s4764_s11  ;;  %1190 = vrot.lane.b32.xlu0 %v4924_v55, %s4764_s11 }
  0xeb   : > { %1186 = vrot.lane.b32.xlu1 %v4922_v53, %s4764_s11  ;;  %1194 = vrot.lane.b32.xlu0 %v4930_v56, %s4764_s11 }
  0xef   : > { %1196 = vrot.lane.b32.xlu1 %v4970_v2, %s4764_s11  ;;  %1192 = vrot.lane.b32.xlu0 %v4949_v61, %s4764_s11 }
  0xf3   : > { %1200 = vrot.lane.b32.xlu1 %v4947_v60, %s4764_s11  ;;  %1202 = vrot.lane.b32.xlu0 %v4981_v5, %s4764_s11 }
  0xf7   : > { %1198 = vrot.lane.b32.xlu1 %v4961_v63, %s4764_s11 }
 0x101   : > { %v588_v38 = vpop.permute.xlu0 %587 }
 0x105   : > { %v592_v43 = vpop.permute.xlu1 %591  ;;  %v598_v44 = vpop.permute.xlu0 %597 }
 0x109   : > { %v594_v45 = vpop.permute.xlu1 %593  ;;  %v590_v46 = vpop.permute.xlu0 %589 }
 0x10a   : > { %v613_v48 = vsel %vm6296_vm5, %v590_v46, %v592_v43  ;;  %v612_v49 = vsel %vm6296_vm5, %v588_v38, %v590_v46 }
 0x10b   : > { %640 = vmatprep.subr.bf16.mxu0 %v613_v48 }
 0x10c   : > { %641 = vmatpush1.bf16.msra.mxu0 %v612_v49 }
 0x10d   : > { %v596_v51 = vpop.permute.xlu1 %595  ;;  %v600_v54 = vpop.permute.xlu0 %599 }
 0x10e   : > { %v615_v57 = vsel %vm6296_vm5, %v596_v51, %v598_v44  ;;  %v614_v59 = vsel %vm6296_vm5, %v594_v45, %v596_v51  ;;  %v4683_v45 = vld [vmem:[%s6291_s1 + $0x38] sm:$0xff]  }
 0x10f   : > { %642 = vmatprep.subr.bf16.mxu0 %v615_v57 }
 0x110   : > { %643 = vmatpush1.bf16.msra.mxu0 %v614_v59  ;;  %v4684_v59 = vld [vmem:[%s6291_s1 + $0x40] sm:$0xff]  }
 0x111   : > { %v604_v62 = vpop.permute.xlu1 %603  ;;  %v602_v0 = vpop.permute.xlu0 %601 }
 0x112   : > { %v617_v3 = vsel %vm6296_vm5, %v602_v0, %v604_v62  ;;  %v616_v7 = vsel %vm6296_vm5, %v600_v54, %v602_v0 }
 0x113   : > { %644 = vmatprep.subr.bf16.mxu0 %v617_v3 }
 0x114   : > { %645 = vmatpush1.bf16.msra.mxu0 %v616_v7 }
 0x115   : > { %v608_v8 = vpop.permute.xlu1 %607  ;;  %v610_v10 = vpop.permute.xlu0 %609 }
 0x116   : > { %v619_v11 = vsel %vm6296_vm5, %v608_v8, %v610_v10 }
 0x117   : > { %646 = vmatprep.subr.bf16.mxu0 %v619_v11 }
 0x119   : > { %v606_v12 = vpop.permute.xlu1 %605  ;;  %v806_v13 = vpop.permute.xlu0 %805 }
 0x11a   : > { %v618_v14 = vsel %vm6296_vm5, %v606_v12, %v608_v8 }
 0x11b   : > { %647 = vmatpush1.bf16.msra.mxu0 %v618_v14 }
 0x11d   : > { %v810_v16 = vpop.permute.xlu1 %809  ;;  %v816_v17 = vpop.permute.xlu0 %815 }
 0x11e   : > { %4095 = vmatmul.mubr.msk.bf16.vlgmr.msra.gmra.mrb[0].mxu0 %vm432_vm11, %v4680_v15 }
 0x11f   : > { %682 = vmatprep.mubr.bf16.mxu0 %v4756_v1 }
 0x121   : > { %v812_v18 = vpop.permute.xlu1 %811  ;;  %v808_v19 = vpop.permute.xlu0 %807 }
 0x122   : > { %v831_v21 = vsel %vm6295_vm6, %v808_v19, %v810_v16  ;;  %v830_v22 = vsel %vm6295_vm6, %v806_v13, %v808_v19 }
 0x123   : > { %858 = vmatprep.subr.bf16.mxu0 %v831_v21 }
 0x124   : > { %859 = vmatpush1.bf16.msra.mxu0 %v830_v22 }
 0x125   : > { %v814_v25 = vpop.permute.xlu1 %813  ;;  %v818_v26 = vpop.permute.xlu0 %817 }
 0x126   : > { %4096 = vmatmul.mubr.msk.bf16.gmra.mrb[4].mxu0 %vm432_vm11, %v4681_v24  ;;  %v833_v28 = vsel %vm6295_vm6, %v814_v25, %v816_v17  ;;  %v832_v29 = vsel %vm6295_vm6, %v812_v18, %v814_v25  ;;  %v4685_v17 = vld [vmem:[%s6291_s1 + $0x48] sm:$0xff]  }
 0x127   : > { %860 = vmatprep.subr.bf16.mxu0 %v833_v28  ;;  %692 = vmatprep.mubr.bf16.mxu0 %v4756_v1 }
 0x128   : > { %861 = vmatpush1.bf16.msra.mxu0 %v832_v29 }
 0x129   : > { %v822_v30 = vpop.permute.xlu1 %821  ;;  %v820_v31 = vpop.permute.xlu0 %819 }
 0x12a   : > { %v835_v32 = vsel %vm6295_vm6, %v820_v31, %v822_v30  ;;  %v834_v33 = vsel %vm6295_vm6, %v818_v26, %v820_v31 }
 0x12b   : > { %862 = vmatprep.subr.bf16.mxu0 %v835_v32  ;;  %v4686_v32 = vld [vmem:[%s6291_s1 + $0x50] sm:$0xff]  }
 0x12c   : > { %863 = vmatpush1.bf16.msra.mxu0 %v834_v33 }
 0x12d   : > { %v826_v35 = vpop.permute.xlu1 %825  ;;  %v828_v36 = vpop.permute.xlu0 %827 }
 0x12e   : > { %4097 = vmatmul.mubr.msk.bf16.gmra.mrb[8].mxu0 %vm432_vm11, %v4682_v34  ;;  %v837_v37 = vsel %vm6295_vm6, %v826_v35, %v828_v36 }
 0x12f   : > { %864 = vmatprep.subr.bf16.mxu0 %v837_v37  ;;  %702 = vmatprep.mubr.bf16.mxu0 %v4756_v1 }
 0x131   : > { %v824_v38 = vpop.permute.xlu1 %823  ;;  %v1010_v43 = vpop.permute.xlu0 %1009 }
 0x132   : > { %v836_v44 = vsel %vm6295_vm6, %v824_v38, %v826_v35 }
 0x133   : > { %865 = vmatpush1.bf16.msra.mxu0 %v836_v44 }
 0x135   : > { %v1014_v46 = vpop.permute.xlu1 %1013  ;;  %v5184_v48 = vpop.permute.xlu0 %1324 }
 0x136   : > { %vm6300_vm13 = vcmp.ne.s16.totalorder %v5184_v48, 0  ;;  %4098 = vmatmul.mubr.msk.bf16.gmra.mrb[12].mxu0 %vm432_vm11, %v4683_v45 }
 0x137   : > { %v1333_v49 = vsel %vm6300_vm13, %v4933_v58, 0  ;;  %890 = vmatprep.mubr.bf16.mxu0 %v4756_v1  ;;  %v1336_v18 = vsel %vm6300_vm13, %v4924_v55, 0  ;;  %v1339_v19 = vsel %vm6300_vm13, %v4970_v2, 0  ;;  %v1342_v38 = vsel %vm6300_vm13, %v4981_v5, 0 }
 0x138   : > { %1388 = vrot.lane.b32.xlu1 %v1333_v49, %s4766_s27 }
 0x139   : > { %v5193_v51 = vpop.permute.xlu1 %1322  ;;  %v1020_v54 = vpop.permute.xlu0 %1019 }
 0x13a   : > { %v5197_v57 = vsel %vm1326_vm3, %v5193_v51, %v5184_v48  ;;  %vm6299_vm6 = vcmp.ne.s16.totalorder %v5193_v51, 0  ;;  %vm6301_vm3 = vcmask 908288  }
 0x13b   : > { %vm1329_vm5 = vcmp.ne.s16.totalorder %v5197_v57, 0  ;;  %v1331_v62 = vsel %vm6299_vm6, %v4911_v50, 0  ;;  %v1334_v12 = vsel %vm6299_vm6, %v4922_v53, 0  ;;  %v1337_v33 = vsel %vm6299_vm6, %v4949_v61, 0 }
 0x13c   : > { %1384 = vrot.lane.b32.xlu0 %v1331_v62, %s4766_s27  ;;  %v1335_v0 = vsel %vm1329_vm5, %v4920_v52, 0  ;;  %v1332_v11 = vsel %vm1329_vm5, %v4903_v47, 0  ;;  %v1338_v26 = vsel %vm1329_vm5, %v4930_v56, 0  ;;  %v1341_v28 = vsel %vm1329_vm5, %v4947_v60, 0 }
 0x13d   : > { %v1016_v3 = vpop.permute.xlu1 %1015  ;;  %1392 = vrot.lane.b32.xlu1 %v1335_v0, %s4766_s27  ;;  %v1012_v7 = vpop.permute.xlu0 %1011  ;;  %v1340_v34 = vsel %vm6299_vm6, %v4961_v63, 0 }
 0x13e   : > { %4111 = vmatmul.mubr.msk.bf16.vlgmr.msra.gmra.mrb[0].mxu0 %vm432_vm11, %v4684_v59  ;;  %v1035_v8 = vsel %vm6298_vm1, %v1012_v7, %v1014_v46  ;;  %v1034_v10 = vsel %vm6298_vm1, %v1010_v43, %v1012_v7  ;;  %v4687_v46 = vld [vmem:[%s6291_s1 + $0x58] sm:$0xff]  }
 0x13f   : > { %1062 = vmatprep.subr.bf16.mxu0 %v1035_v8  ;;  %900 = vmatprep.mubr.bf16.mxu0 %v4756_v1  ;;  %v4688_v8 = vld [vmem:[%s6291_s1 + $0x60] sm:$0xff]  }
 0x140   : > { %1386 = vrot.lane.b32.xlu0 %v1332_v11, %s4766_s27  ;;  %1063 = vmatpush1.bf16.msra.mxu0 %v1034_v10 }
 0x141   : > { %v1018_v13 = vpop.permute.xlu1 %1017  ;;  %1390 = vrot.lane.b32.xlu1 %v1334_v12, %s4766_s27  ;;  %v1022_v14 = vpop.permute.xlu0 %1021 }
 0x142   : > { %v1037_v15 = vsel %vm6298_vm1, %v1018_v13, %v1020_v54  ;;  %v1036_v16 = vsel %vm6298_vm1, %v1016_v3, %v1018_v13 }
 0x143   : > { %1064 = vmatprep.subr.bf16.mxu0 %v1037_v15 }
 0x144   : > { %1394 = vrot.lane.b32.xlu0 %v1336_v18, %s4766_s27  ;;  %1065 = vmatpush1.bf16.msra.mxu0 %v1036_v16 }
 0x145   : > { %v1026_v21 = vpop.permute.xlu1 %1025  ;;  %1400 = vrot.lane.b32.xlu1 %v1339_v19, %s4766_s27  ;;  %v1024_v22 = vpop.permute.xlu0 %1023  ;;  %v4689_v19 = vld [vmem:[%s6291_s1 + $0x68] sm:$0xff]  }
 0x146   : > { %4112 = vmatmul.mubr.msk.bf16.gmra.mrb[4].mxu0 %vm432_vm11, %v4685_v17  ;;  %v1039_v24 = vsel %vm6298_vm1, %v1024_v22, %v1026_v21  ;;  %v1038_v25 = vsel %vm6298_vm1, %v1022_v14, %v1024_v22 }
 0x147   : > { %1066 = vmatprep.subr.bf16.mxu0 %v1039_v24  ;;  %910 = vmatprep.mubr.bf16.mxu0 %v4756_v1 }
 0x148   : > { %1398 = vrot.lane.b32.xlu0 %v1338_v26, %s4766_s27  ;;  %1067 = vmatpush1.bf16.msra.mxu0 %v1038_v25 }
 0x149   : > { %v1030_v29 = vpop.permute.xlu1 %1029  ;;  %1404 = vrot.lane.b32.xlu1 %v1341_v28, %s4766_s27  ;;  %v1032_v30 = vpop.permute.xlu0 %1031 }
 0x14a   : > { %v1041_v31 = vsel %vm6298_vm1, %v1030_v29, %v1032_v30 }
 0x14b   : > { %1068 = vmatprep.subr.bf16.mxu0 %v1041_v31 }
 0x14c   : > { %1396 = vrot.lane.b32.xlu0 %v1337_v33, %s4766_s27 }
 0x14d   : > { %v1028_v35 = vpop.permute.xlu1 %1027  ;;  %1402 = vrot.lane.b32.xlu1 %v1340_v34, %s4766_s27  ;;  %v1183_v36 = vpop.permute.xlu0 %1182 }
 0x14e   : > { %v1040_v37 = vsel %vm6298_vm1, %v1028_v35, %v1030_v29  ;;  %4113 = vmatmul.mubr.msk.bf16.gmra.mrb[8].mxu0 %vm432_vm11, %v4686_v32  ;;  %vm1530_vm1 = vcmask 261120   ;;  %v4690_v32 = vld [vmem:[%s6291_s1 + $0x70] sm:$0xff]  }
 0x14f   : > { %1069 = vmatpush1.bf16.msra.mxu0 %v1040_v37  ;;  %920 = vmatprep.mubr.bf16.mxu0 %v4756_v1  ;;  %v4691_v37 = vld [vmem:[%s6291_s1 + $0x78] sm:$0xff]  }
 0x150   : > { %1406 = vrot.lane.b32.xlu0 %v1342_v38, %s4766_s27  ;;  %v4692_v38 = vld [vmem:[%s6291_s1 + $0x80] sm:$0xff]  }
 0x151   : > { %v1185_v43 = vpop.permute.xlu1 %1184  ;;  %v1181_v44 = vpop.permute.xlu0 %1180 }
 0x152   : > { %v1206_v45 = vsel %vm6301_vm3, %v1183_v36, %v1185_v43  ;;  %v1205_v13 = vsel %vm6301_vm3, %v1181_v44, %v1183_v36  ;;  %v4693_v43 = vld [vmem:[%s6291_s1 + $0x88] sm:$0xff]   ;;  %v4694_v44 = vld [vmem:[%s6291_s1 + $0x90] sm:$0xff]  }
 0x153   : > { %1233 = vmatprep.subr.bf16.mxu0 %v1206_v45  ;;  %v4695_v45 = vld [vmem:[%s6291_s1 + $0x98] sm:$0xff]  }
 0x155   : > { %v5272_v49 = vpop.permute.xlu1 %1526  ;;  %v5274_v54 = vpop.permute.xlu0 %1528 }
 0x156   : > { %v5278_v59 = vsel %vm1530_vm1, %v5272_v49, %v5274_v54  ;;  %vm6304_vm6 = vcmp.ne.s16.totalorder %v5274_v54, 0  ;;  %4114 = vmatmul.mubr.msk.bf16.gmra.mrb[12].mxu0 %vm432_vm11, %v4687_v46  ;;  %vm6302_vm1 = vcmp.ne.s16.totalorder %v5272_v49, 0 }
 0x157   : > { %vm6305_vm13 = vcmp.ne.s16.totalorder %v5278_v59, 0  ;;  %v1537_v62 = vsel %vm6304_vm6, %v4933_v58, 0  ;;  %1094 = vmatprep.mubr.bf16.mxu0 %v4756_v1  ;;  %v1535_v10 = vsel %vm6302_vm1, %v4911_v50, 0  ;;  %v1538_v21 = vsel %vm6302_vm1, %v4922_v53, 0 }
 0x158   : > { %1592 = vrot.lane.b32.xlu1 %v1537_v62, %s4767_s13  ;;  %v1536_v0 = vsel %vm6305_vm13, %v4903_v47, 0  ;;  %v1539_v15 = vsel %vm6305_vm13, %v4920_v52, 0  ;;  %v1543_v28 = vsel %vm6304_vm6, %v4970_v2, 0  ;;  %v1542_v29 = vsel %vm6305_vm13, %v4930_v56, 0 }
 0x159   : > { %v1189_v3 = vpop.permute.xlu1 %1188  ;;  %1590 = vrot.lane.b32.xlu0 %v1536_v0, %s4767_s13  ;;  %v1191_v7 = vpop.permute.xlu0 %1190  ;;  %v1545_v33 = vsel %vm6305_vm13, %v4947_v60, 0  ;;  %v1541_v34 = vsel %vm6302_vm1, %v4949_v61, 0  ;;  %v1544_v35 = vsel %vm6302_vm1, %v4961_v63, 0  ;;  %v1546_v36 = vsel %vm6304_vm6, %v4981_v5, 0 }
 0x15a   : > { %v1208_v14 = vsel %vm6301_vm3, %v1189_v3, %v1191_v7  ;;  %vm6308_vm1 = vcmask 785408   ;;  %vm6306_vm13 = vcmask 777216  }
 0x15c   : > { %1901 = vrot.lane.b32.xlu1 %v4888_v40, %s4768_s19 }
 0x15d   : > { %v1187_v11 = vpop.permute.xlu1 %1186  ;;  %1588 = vrot.lane.b32.xlu0 %v1535_v10, %s4767_s13  ;;  %v1195_v12 = vpop.permute.xlu0 %1194 }
 0x15e   : > { %4127 = vmatmul.mubr.msk.bf16.vlgmr.msra.gmra.mrb[0].mxu0 %vm432_vm11, %v4688_v8  ;;  %v1207_v17 = vsel %vm6301_vm3, %v1187_v11, %v1189_v3 }
 0x15f   : > { %1234 = vmatpush1.bf16.msra.mxu0 %v1205_v13  ;;  %1104 = vmatprep.mubr.bf16.mxu0 %v4756_v1 }
 0x160   : > { %1235 = vmatprep.subr.bf16.mxu0 %v1208_v14  ;;  %1596 = vrot.lane.b32.xlu1 %v1539_v15, %s4767_s13 }
 0x161   : > { %v1197_v40 = vpop.permute.xlu1 %1196  ;;  %1903 = vrot.lane.b32.xlu0 %v4885_v39, %s4768_s19  ;;  %v1193_v16 = vpop.permute.xlu0 %1192  ;;  %v1540_v39 = vsel %vm6304_vm6, %v4924_v55, 0 }
 0x162   : > { %v1210_v18 = vsel %vm6301_vm3, %v1195_v12, %v1197_v40  ;;  %v1209_v25 = vsel %vm6301_vm3, %v1193_v16, %v1195_v12 }
 0x163   : > { %1236 = vmatpush1.bf16.msra.mxu0 %v1207_v17 }
 0x164   : > { %1237 = vmatprep.subr.bf16.mxu0 %v1210_v18  ;;  %1594 = vrot.lane.b32.xlu1 %v1538_v21, %s4767_s13 }
 0x165   : > { %v1201_v22 = vpop.permute.xlu1 %1200  ;;  %1598 = vrot.lane.b32.xlu0 %v1540_v39, %s4767_s13  ;;  %v1203_v24 = vpop.permute.xlu0 %1202 }
 0x166   : > { %v1212_v26 = vsel %vm6301_vm3, %v1201_v22, %v1203_v24  ;;  %4128 = vmatmul.mubr.msk.bf16.gmra.mrb[4].mxu0 %vm432_vm11, %v4689_v19  ;;  %v4696_v24 = vld [vmem:[%s6291_s1 + $0xa0] sm:$0xff]  }
 0x167   : > { %1238 = vmatpush1.bf16.msra.mxu0 %v1209_v25  ;;  %1114 = vmatprep.mubr.bf16.mxu0 %v4756_v1 }
 0x168   : > { %1239 = vmatprep.subr.bf16.mxu0 %v1212_v26  ;;  %1604 = vrot.lane.b32.xlu1 %v1543_v28, %s4767_s13 }
 0x169   : > { %v1199_v30 = vpop.permute.xlu1 %1198  ;;  %1602 = vrot.lane.b32.xlu0 %v1542_v29, %s4767_s13  ;;  %v4697_v29 = vld [vmem:[%s6291_s1 + $0xa8] sm:$0xff]  }
 0x16a   : > { %v1211_v31 = vsel %vm6301_vm3, %v1199_v30, %v1201_v22  ;;  %vm6303_vm3 = vcmask 900096  }
 0x16b   : > { %1240 = vmatpush1.bf16.msra.mxu0 %v1211_v31 }
 0x16c   : > { %1608 = vrot.lane.b32.xlu1 %v1545_v33, %s4767_s13 }
 0x16d   : > { %1600 = vrot.lane.b32.xlu0 %v1541_v34, %s4767_s13 }
 0x16e   : > { %4129 = vmatmul.mubr.msk.bf16.gmra.mrb[8].mxu0 %vm432_vm11, %v4690_v32 }
 0x16f   : > { %1124 = vmatprep.mubr.bf16.mxu0 %v4756_v1 }
 0x170   : > { %1606 = vrot.lane.b32.xlu1 %v1544_v35, %s4767_s13 }
 0x171   : > { %1610 = vrot.lane.b32.xlu0 %v1546_v36, %s4767_s13  ;;  %v4698_v36 = vld [vmem:[%s6291_s1 + $0xb0] sm:$0xff]  }
 0x174   : > { %1763 = vrot.lane.b32.xlu1 %v4933_v58, %s4769_s5 }
 0x175   : > { %1761 = vrot.lane.b32.xlu0 %v4903_v47, %s4769_s5 }
 0x176   : > { %4130 = vmatmul.mubr.msk.bf16.gmra.mrb[12].mxu0 %vm432_vm11, %v4691_v37 }
 0x177   : > { %1265 = vmatprep.mubr.bf16.mxu0 %v4756_v1 }
 0x178   : > { %1767 = vrot.lane.b32.xlu1 %v4920_v52, %s4769_s5 }
 0x179   : > { %1759 = vrot.lane.b32.xlu0 %v4911_v50, %s4769_s5 }
 0x17c   : > { %1765 = vrot.lane.b32.xlu1 %v4922_v53, %s4769_s5 }
 0x17d   : > { %1769 = vrot.lane.b32.xlu0 %v4924_v55, %s4769_s5 }
 0x17e   : > { %4143 = vmatmul.mubr.msk.bf16.vlgmr.msra.gmra.mrb[0].mxu0 %vm432_vm11, %v4692_v38 }
 0x17f   : > { %1275 = vmatprep.mubr.bf16.mxu0 %v4756_v1 }
 0x180   : > { %1775 = vrot.lane.b32.xlu1 %v4970_v2, %s4769_s5 }
 0x181   : > { %1773 = vrot.lane.b32.xlu0 %v4930_v56, %s4769_s5 }
 0x184   : > { %1779 = vrot.lane.b32.xlu1 %v4947_v60, %s4769_s5 }
 0x185   : > { %1771 = vrot.lane.b32.xlu0 %v4949_v61, %s4769_s5 }
 0x186   : > { %4144 = vmatmul.mubr.msk.bf16.gmra.mrb[4].mxu0 %vm432_vm11, %v4693_v43 }
 0x187   : > { %1285 = vmatprep.mubr.bf16.mxu0 %v4756_v1 }
 0x188   : > { %1777 = vrot.lane.b32.xlu1 %v4961_v63, %s4769_s5 }
 0x189   : > { %1781 = vrot.lane.b32.xlu0 %v4981_v5, %s4769_s5 }
 0x18e   : > { %4145 = vmatmul.mubr.msk.bf16.gmra.mrb[8].mxu0 %vm432_vm11, %v4694_v44 }
 0x18f   : > { %1295 = vmatprep.mubr.bf16.mxu0 %v4756_v1 }
 0x196   : > { %4146 = vmatmul.mubr.msk.bf16.gmra.mrb[12].mxu0 %vm432_vm11, %v4695_v45 }
 0x197   : > { %1469 = vmatprep.mubr.bf16.mxu0 %v4756_v1 }
 0x1aa   : > { %v1389_v46 = vpop.permute.xlu1 %1388 }
 0x1ae   : > { %v1385_v62 = vpop.permute.xlu0 %1384 }
 0x1af   : > { %v1393_v0 = vpop.permute.xlu1 %1392 }
 0x1b2   : > { %v1387_v3 = vpop.permute.xlu0 %1386 }
 0x1b3   : > { %v1391_v7 = vpop.permute.xlu1 %1390  ;;  %v1410_v8 = vsel %vm6303_vm3, %v1387_v3, %v1389_v46  ;;  %v1409_v10 = vsel %vm6303_vm3, %v1385_v62, %v1387_v3 }
 0x1b4   : > { %1437 = vmatprep.subr.bf16.mxu0 %v1410_v8  ;;  %v1411_v14 = vsel %vm6303_vm3, %v1391_v7, %v1393_v0  ;;  %v4699_v7 = vld [vmem:[%s6291_s1 + $0xb8] sm:$0xff]  }
 0x1b5   : > { %1438 = vmatpush1.bf16.msra.mxu0 %v1409_v10 }
 0x1b6   : > { %v1395_v11 = vpop.permute.xlu0 %1394 }
 0x1b7   : > { %v1401_v12 = vpop.permute.xlu1 %1400  ;;  %v1412_v13 = vsel %vm6303_vm3, %v1393_v0, %v1395_v11 }
 0x1b8   : > { %1439 = vmatprep.subr.bf16.mxu0 %v1412_v13 }
 0x1b9   : > { %1440 = vmatpush1.bf16.msra.mxu0 %v1411_v14 }
 0x1ba   : > { %v1399_v15 = vpop.permute.xlu0 %1398 }
 0x1bb   : > { %v1405_v40 = vpop.permute.xlu1 %1404  ;;  %v1414_v16 = vsel %vm6303_vm3, %v1399_v15, %v1401_v12 }
 0x1bc   : > { %1441 = vmatprep.subr.bf16.mxu0 %v1414_v16 }
 0x1be   : > { %v1397_v17 = vpop.permute.xlu0 %1396 }
 0x1bf   : > { %v1413_v18 = vsel %vm6303_vm3, %v1397_v17, %v1399_v15  ;;  %v1403_v19 = vpop.permute.xlu1 %1402 }
 0x1c0   : > { %1442 = vmatpush1.bf16.msra.mxu0 %v1413_v18  ;;  %v1415_v22 = vsel %vm6303_vm3, %v1403_v19, %v1405_v40 }
 0x1c2   : > { %v1407_v21 = vpop.permute.xlu0 %1406 }
 0x1c3   : > { %v1416_v39 = vsel %vm6303_vm3, %v1405_v40, %v1407_v21  ;;  %v4700_v40 = vld [vmem:[%s6291_s1 + $0xc0] sm:$0xff]  }
 0x1c4   : > { %1443 = vmatprep.subr.bf16.mxu0 %v1416_v39 }
 0x1c5   : > { %1444 = vmatpush1.bf16.msra.mxu0 %v1415_v22 }
 0x1c8   : > { %4159 = vmatmul.mubr.msk.bf16.vlgmr.msra.gmra.mrb[0].mxu0 %vm432_vm11, %v4696_v24 }
 0x1c9   : > { %1479 = vmatprep.mubr.bf16.mxu0 %v4756_v1 }
 0x1ca   : > { %v1593_v25 = vpop.permute.xlu1 %1592 }
 0x1cb   : > { %v1591_v26 = vpop.permute.xlu0 %1590 }
 0x1cc   : > { %v1614_v28 = vsel %vm6308_vm1, %v1591_v26, %v1593_v25 }
 0x1cd   : > { %1641 = vmatprep.subr.bf16.mxu0 %v1614_v28 }
 0x1ce   : > { %v5423_v30 = vpop.permute.xlu1 %1901 }
 0x1cf   : > { %v1589_v31 = vpop.permute.xlu0 %1588 }
 0x1d0   : > { %v1613_v32 = vsel %vm6308_vm1, %v1589_v31, %v1591_v26  ;;  %4160 = vmatmul.mubr.msk.bf16.gmra.mrb[4].mxu0 %vm432_vm11, %v4697_v29 }
 0x1d1   : > { %1642 = vmatpush1.bf16.msra.mxu0 %v1613_v32  ;;  %1489 = vmatprep.mubr.bf16.mxu0 %v4756_v1  ;;  %v4702_v32 = vld [vmem:[%s6291_s1 + $0xd0] sm:$0xff]  }
 0x1d2   : > { %v1597_v33 = vpop.permute.xlu1 %1596 }
 0x1d3   : > { %v5428_v34 = vpop.permute.xlu0 %1903 }
 0x1d4   : > { %v5433_v35 = vsel %vm234_vm0, %v5423_v30, %v5428_v34  ;;  %vm6310_vm3 = vcmp.ne.s16.totalorder %v5428_v34, 0  ;;  %vm6309_vm0 = vcmp.ne.s16.totalorder %v5423_v30, 0 }
 0x1d5   : > { %vm1908_vm6 = vcmp.ne.s16.totalorder %v5433_v35, 0  ;;  %v1912_v37 = vsel %vm6310_vm3, %v4933_v58, 0  ;;  %v1918_v12 = vsel %vm6310_vm3, %v4970_v2, 0  ;;  %v1921_v21 = vsel %vm6310_vm3, %v4981_v5, 0 }
 0x1d6   : > { %v1595_v38 = vpop.permute.xlu1 %1594  ;;  %1967 = vrot.lane.b32.xlu1 %v1912_v37, %s4770_s6  ;;  %v1911_v43 = vsel %vm1908_vm6, %v4903_v47, 0  ;;  %v1914_v58 = vsel %vm1908_vm6, %v4920_v52, 0  ;;  %v1910_v47 = vsel %vm6309_vm0, %v4911_v50, 0  ;;  %v1913_v52 = vsel %vm6309_vm0, %v4922_v53, 0 }
 0x1d7   : > { %1965 = vrot.lane.b32.xlu0 %v1911_v43, %s4770_s6  ;;  %v1599_v44 = vpop.permute.xlu0 %1598  ;;  %v1615_v46 = vsel %vm6308_vm1, %v1595_v38, %v1597_v33  ;;  %v1915_v50 = vsel %vm6310_vm3, %v4924_v55, 0  ;;  %v1917_v55 = vsel %vm1908_vm6, %v4930_v56, 0  ;;  %v1920_v2 = vsel %vm1908_vm6, %v4947_v60, 0  ;;  %v325_v43 = vld [vmem:[%s6293_s3 + $0x8] sm:$0xff] }
 0x1d8   : > { %v1616_v45 = vsel %vm6308_vm1, %v1597_v33, %v1599_v44  ;;  %4161 = vmatmul.mubr.msk.bf16.gmra.mrb[8].mxu0 %vm432_vm11, %v4698_v36  ;;  %v1916_v56 = vsel %vm6309_vm0, %v4949_v61, 0  ;;  %v1919_v60 = vsel %vm6309_vm0, %v4961_v63, 0  ;;  %v4701_v63 = vld [vmem:[%s6291_s1 + $0xc8] sm:$0xff]   ;;  %v324_v44 = vld [vmem:[%s6293_s3] sm:$0xff] }
 0x1d9   : > { %1643 = vmatprep.subr.bf16.mxu0 %v1616_v45  ;;  %1499 = vmatprep.mubr.bf16.mxu0 %v4756_v1 }
 0x1da   : > { %v1605_v62 = vpop.permute.xlu1 %1604  ;;  %1971 = vrot.lane.b32.xlu1 %v1914_v58, %s4770_s6  ;;  %1644 = vmatpush1.bf16.msra.mxu0 %v1615_v46  ;;  %v326_v58 = vld [vmem:[%s6293_s3 + $0x10] sm:$0xff] }
 0x1db   : > { %1963 = vrot.lane.b32.xlu0 %v1910_v47, %s4770_s6  ;;  %v1603_v0 = vpop.permute.xlu0 %1602  ;;  %v4703_v47 = vld [vmem:[%s6291_s1 + $0xd8] sm:$0xff]  }
 0x1dc   : > { %v1618_v3 = vsel %vm6308_vm1, %v1603_v0, %v1605_v62  ;;  %v327_v62 = vld [vmem:[%s6293_s3 + $0x18] sm:$0xff] }
 0x1dd   : > { %1645 = vmatprep.subr.bf16.mxu0 %v1618_v3  ;;  %v329_v3 = vld [vmem:[%s6293_s3 + $0x28] sm:$0xff] }
 0x1de   : > { %v1609_v8 = vpop.permute.xlu1 %1608  ;;  %1969 = vrot.lane.b32.xlu1 %v1913_v52, %s4770_s6  ;;  %v331_v52 = vld [vmem:[%s6293_s3 + $0x38] sm:$0xff] }
 0x1df   : > { %1973 = vrot.lane.b32.xlu0 %v1915_v50, %s4770_s6  ;;  %v1601_v10 = vpop.permute.xlu0 %1600  ;;  %v4705_v50 = vld [vmem:[%s6291_s1 + $0xe8] sm:$0xff]  }
 0x1e0   : > { %v1617_v11 = vsel %vm6308_vm1, %v1601_v10, %v1603_v0  ;;  %4162 = vmatmul.mubr.msk.bf16.gmra.mrb[12].mxu0 %vm432_vm11, %v4699_v7  ;;  %v328_v0 = vld [vmem:[%s6293_s3 + $0x20] sm:$0xff]  ;;  %v330_v7 = vld [vmem:[%s6293_s3 + $0x30] sm:$0xff] }
 0x1e1   : > { %1646 = vmatpush1.bf16.msra.mxu0 %v1617_v11  ;;  %1673 = vmatprep.mubr.bf16.mxu0 %v4756_v1  ;;  %v4706_v10 = vld [vmem:[%s6291_s1 + $0xf0] sm:$0xff]   ;;  %v4707_v11 = vld [vmem:[%s6291_s1 + $0xf8] sm:$0xff]  }
 0x1e2   : > { %v1607_v53 = vpop.permute.xlu1 %1606  ;;  %1979 = vrot.lane.b32.xlu1 %v1918_v12, %s4770_s6 }
 0x1e3   : > { %1977 = vrot.lane.b32.xlu0 %v1917_v55, %s4770_s6  ;;  %v1611_v13 = vpop.permute.xlu0 %1610  ;;  %v1619_v15 = vsel %vm6308_vm1, %v1607_v53, %v1609_v8 }
 0x1e4   : > { %v1620_v14 = vsel %vm6308_vm1, %v1609_v8, %v1611_v13  ;;  %v4704_v8 = vld [vmem:[%s6291_s1 + $0xe0] sm:$0xff]  }
 0x1e5   : > { %1647 = vmatprep.subr.bf16.mxu0 %v1620_v14 }
 0x1e6   : > { %v1764_v16 = vpop.permute.xlu1 %1763  ;;  %1983 = vrot.lane.b32.xlu1 %v1920_v2, %s4770_s6  ;;  %1648 = vmatpush1.bf16.msra.mxu0 %v1619_v15 }
 0x1e7   : > { %1975 = vrot.lane.b32.xlu0 %v1916_v56, %s4770_s6  ;;  %v1762_v17 = vpop.permute.xlu0 %1761 }
 0x1e8   : > { %v1785_v18 = vsel %vm6306_vm13, %v1762_v17, %v1764_v16 }
 0x1e9   : > { %1812 = vmatprep.subr.bf16.mxu0 %v1785_v18  ;;  %4175 = vmatmul.mubr.msk.bf16.vlgmr.msra.gmra.mrb[0].mxu0 %vm432_vm11, %v4700_v40 }
 0x1ea   : > { %v1768_v19 = vpop.permute.xlu1 %1767  ;;  %1981 = vrot.lane.b32.xlu1 %v1919_v60, %s4770_s6  ;;  %1683 = vmatprep.mubr.bf16.mxu0 %v4756_v1 }
 0x1eb   : > { %1985 = vrot.lane.b32.xlu0 %v1921_v21, %s4770_s6  ;;  %v1760_v61 = vpop.permute.xlu0 %1759 }
 0x1ec   : > { %v1784_v39 = vsel %vm6306_vm13, %v1760_v61, %v1762_v17 }
 0x1ed   : > { %1813 = vmatpush1.bf16.msra.mxu0 %v1784_v39 }
 0x1ee   : > { %v1766_v22 = vpop.permute.xlu1 %1765  ;;  %339 = vperm.xlu1 %4675, %v325_v43  }
 0x1ef   : > { %v1770_v24 = vpop.permute.xlu0 %1769  ;;  %v1786_v26 = vsel %vm6306_vm13, %v1766_v22, %v1768_v19  ;;  %334 = vperm.xlu0 %4674, %v324_v44  }
 0x1f0   : > { %v1787_v25 = vsel %vm6306_vm13, %v1768_v19, %v1770_v24 }
 0x1f1   : > { %1814 = vmatprep.subr.bf16.mxu0 %v1787_v25  ;;  %4176 = vmatmul.mubr.msk.bf16.gmra.mrb[4].mxu0 %vm432_vm11, %v4701_v63  ;;  %v4708_v25 = vld [vmem:[%s6291_s1 + $0x100] sm:$0xff]  }
 0x1f2   : > { %v1776_v5 = vpop.permute.xlu1 %1775  ;;  %1815 = vmatpush1.bf16.msra.mxu0 %v1786_v26  ;;  %1693 = vmatprep.mubr.bf16.mxu0 %v4756_v1  ;;  %v4709_v26 = vld [vmem:[%s6291_s1 + $0x108] sm:$0xff]  }
 0x1f3   : > { %v1774_v28 = vpop.permute.xlu0 %1773  ;;  %344 = vperm.xlu1 %4675, %v326_v58   ;;  %349 = vperm.xlu0 %4674, %v327_v62  }
 0x1f4   : > { %v1789_v29 = vsel %vm6306_vm13, %v1774_v28, %v1776_v5  ;;  %v4710_v5 = vld [vmem:[%s6291_s1 + $0x110] sm:$0xff]  }
 0x1f5   : > { %1816 = vmatprep.subr.bf16.mxu0 %v1789_v29 }
 0x1f6   : > { %v1780_v31 = vpop.permute.xlu1 %1779 }
 0x1f7   : > { %v1772_v33 = vpop.permute.xlu0 %1771  ;;  %354 = vperm.xlu1 %4675, %v328_v0   ;;  %359 = vperm.xlu0 %4674, %v329_v3  }
 0x1f8   : > { %v1788_v36 = vsel %vm6306_vm13, %v1772_v33, %v1774_v28  ;;  %v4711_v28 = vld [vmem:[%s6291_s1 + $0x118] sm:$0xff]  }
 0x1f9   : > { %1817 = vmatpush1.bf16.msra.mxu0 %v1788_v36 }
 0x1fa   : > { %v1778_v37 = vpop.permute.xlu1 %1777  ;;  %4177 = vmatmul.mubr.msk.bf16.gmra.mrb[8].mxu0 %vm432_vm11, %v4702_v32 }
 0x1fb   : > { %v1782_v38 = vpop.permute.xlu0 %1781  ;;  %1703 = vmatprep.mubr.bf16.mxu0 %v4756_v1  ;;  %v1790_v46 = vsel %vm6306_vm13, %v1778_v37, %v1780_v31  ;;  %364 = vperm.xlu1 %4675, %v330_v7  }
 0x1fc   : > { %v1791_v45 = vsel %vm6306_vm13, %v1780_v31, %v1782_v38  ;;  %369 = vperm.xlu0 %4674, %v331_v52   ;;  %vm6307_vm13 = vcmask 769024  }
 0x1fd   : > { %1818 = vmatprep.subr.bf16.mxu0 %v1791_v45 }
 0x1fe   : > { %1819 = vmatpush1.bf16.msra.mxu0 %v1790_v46 }
 0x202   : > { %4178 = vmatmul.mubr.msk.bf16.gmra.mrb[12].mxu0 %vm432_vm11, %v4703_v47 }
 0x203   : > { %1844 = vmatprep.mubr.bf16.mxu0 %v4756_v1 }
 0x20a   : > { %4191 = vmatmul.mubr.msk.bf16.vlgmr.msra.gmra.mrb[0].mxu0 %vm432_vm11, %v4704_v8 }
 0x20b   : > { %1854 = vmatprep.mubr.bf16.mxu0 %v4756_v1 }
 0x212   : > { %4192 = vmatmul.mubr.msk.bf16.gmra.mrb[4].mxu0 %vm432_vm11, %v4705_v50 }
 0x213   : > { %1864 = vmatprep.mubr.bf16.mxu0 %v4756_v1 }
 0x21a   : > { %4193 = vmatmul.mubr.msk.bf16.gmra.mrb[8].mxu0 %vm432_vm11, %v4706_v10 }
 0x21b   : > { %1874 = vmatprep.mubr.bf16.mxu0 %v4756_v1 }
 0x222   : > { %4194 = vmatmul.mubr.msk.bf16.gmra.mrb[12].mxu0 %vm432_vm11, %v4707_v11 }
 0x223   : > { %2048 = vmatprep.mubr.bf16.mxu0 %v4756_v1 }
 0x248   : > { %v1968_v12 = vpop.permute.xlu1 %1967 }
 0x249   : > { %v1966_v53 = vpop.permute.xlu0 %1965 }
 0x24a   : > { %v1989_v55 = vsel %vm6307_vm13, %v1966_v53, %v1968_v12 }
 0x24b   : > { %2016 = vmatprep.subr.bf16.mxu0 %v1989_v55 }
 0x24c   : > { %v1972_v13 = vpop.permute.xlu1 %1971 }
 0x24d   : > { %v1964_v14 = vpop.permute.xlu0 %1963 }
 0x24e   : > { %v1988_v15 = vsel %vm6307_vm13, %v1964_v14, %v1966_v53 }
 0x24f   : > { %2017 = vmatpush1.bf16.msra.mxu0 %v1988_v15 }
 0x250   : > { %v1970_v2 = vpop.permute.xlu1 %1969 }
 0x251   : > { %v1974_v40 = vpop.permute.xlu0 %1973  ;;  %v1990_v56 = vsel %vm6307_vm13, %v1970_v2, %v1972_v13 }
 0x252   : > { %v1991_v16 = vsel %vm6307_vm13, %v1972_v13, %v1974_v40 }
 0x253   : > { %2018 = vmatprep.subr.bf16.mxu0 %v1991_v16 }
 0x254   : > { %v1980_v17 = vpop.permute.xlu1 %1979  ;;  %2019 = vmatpush1.bf16.msra.mxu0 %v1990_v56 }
 0x255   : > { %v1978_v18 = vpop.permute.xlu0 %1977 }
 0x256   : > { %v1993_v60 = vsel %vm6307_vm13, %v1978_v18, %v1980_v17 }
 0x257   : > { %2020 = vmatprep.subr.bf16.mxu0 %v1993_v60 }
 0x258   : > { %v1984_v19 = vpop.permute.xlu1 %1983 }
 0x259   : > { %v1976_v21 = vpop.permute.xlu0 %1975 }
 0x25a   : > { %v1992_v61 = vsel %vm6307_vm13, %v1976_v21, %v1978_v18 }
 0x25b   : > { %2021 = vmatpush1.bf16.msra.mxu0 %v1992_v61 }
 0x25c   : > { %v1982_v39 = vpop.permute.xlu1 %1981 }
 0x25d   : > { %v1986_v63 = vpop.permute.xlu0 %1985  ;;  %v1994_v24 = vsel %vm6307_vm13, %v1982_v39, %v1984_v19 }
 0x25e   : > { %v1995_v22 = vsel %vm6307_vm13, %v1984_v19, %v1986_v63 }
 0x25f   : > { %2022 = vmatprep.subr.bf16.mxu0 %v1995_v22 }
 0x260   : > { %2023 = vmatpush1.bf16.msra.mxu0 %v1994_v24 }
 0x263   : > { %4207 = vmatmul.mubr.msk.bf16.vlgmr.msra.gmra.mrb[0].mxu0 %vm432_vm11, %v4708_v25 }
 0x264   : > { %2058 = vmatprep.mubr.bf16.mxu0 %v4756_v1 }
 0x26b   : > { %4208 = vmatmul.mubr.msk.bf16.gmra.mrb[4].mxu0 %vm432_vm11, %v4709_v26 }
 0x26c   : > { %2068 = vmatprep.mubr.bf16.mxu0 %v4756_v1 }
 0x26d   : > { %v340_v36 = vpop.permute.xlu1 %339 }
 0x26e   : > { %v335_v29 = vpop.permute.xlu0 %334 }
 0x272   : > { %v345_v52 = vpop.permute.xlu1 %344  ;;  %v350_v55 = vpop.permute.xlu0 %349 }
 0x273   : > { %4209 = vmatmul.mubr.msk.bf16.gmra.mrb[8].mxu0 %vm432_vm11, %v4710_v5 }
 0x274   : > { %2078 = vmatprep.mubr.bf16.mxu0 %v4756_v1 }
 0x276   : > { %v355_v21 = vpop.permute.xlu1 %354  ;;  %v360_v5 = vpop.permute.xlu0 %359 }
 0x27b   : > { %4210 = vmatmul.mubr.msk.bf16.gmra.mrb[12].mxu0 %vm432_vm11, %v4711_v28 }
 0x336   : > { %v2050_v31 = vpop.f32.mrb[0].mxu0 }
 0x337   : > { %v4363_v32 = vadd.f32 %v2050_v31, %v335_v29  ;;  %v2052_v33 = vpop.f32.mrb[1].mxu0 }
 0x338   : > { %v4364_v37 = vadd.f32 %v2052_v33, %v335_v29  ;;  %v2054_v38 = vpop.f32.mrb[2].mxu0 }
 0x339   : > { %v2121_v43 = vmul.f32 0.02, %v4363_v32  ;;  %v4365_v44 = vadd.f32 %v2054_v38, %v340_v36  ;;  %v2056_v45 = vpop.f32.mrb[3].mxu0  ;;  %vm2105_vm13 = vcmp.ge.f32.partialorder %v4363_v32, 0.0 }
 0x33a   : > { %v2122_v46 = vmul.f32 0.02, %v4364_v37  ;;  %v4366_v58 = vadd.f32 %v2056_v45, %v340_v36  ;;  %vm2106_vm1 = vcmp.ge.f32.partialorder %v4364_v37, 0.0 }
 0x33b   : > { %vm2107_vm0 = vcmp.ge.f32.partialorder %v4365_v44, 0.0  ;;  %v2123_v62 = vmul.f32 0.02, %v4365_v44  ;;  %v2137_v0 = vsel %vm2105_vm13, %v4363_v32, %v2121_v43 }
 0x33c   : > { %vm2108_vm3 = vcmp.ge.f32.partialorder %v4366_v58, 0.0  ;;  %v2124_v47 = vmul.f32 0.02, %v4366_v58  ;;  %v2138_v7 = vsel %vm2106_vm1, %v4364_v37, %v2122_v46  ;;  %v365_v46 = vpop.permute.xlu1 %364 }
 0x33d   : > { %v2139_v3 = vsel %vm2107_vm0, %v4365_v44, %v2123_v62 }
 0x33e   : > { %v2153_v8 = vpack.c.bf16 %v2139_v3, %v2137_v0  ;;  %v2140_v50 = vsel %vm2108_vm3, %v4366_v58, %v2124_v47  ;;  %v2060_v10 = vpop.f32.mrb[4].mxu0 }
 0x33f   : > { %v2154_v11 = vpack.c.bf16 %v2140_v50, %v2138_v7  ;;  %v4367_v12 = vadd.f32 %v2060_v10, %v345_v52  ;;  %v2062_v53 = vpop.f32.mrb[5].mxu0 }
 0x340   : > { %v4368_v13 = vadd.f32 %v2062_v53, %v345_v52  ;;  %v2064_v14 = vpop.f32.mrb[6].mxu0  ;;  %2169 = vrot.lane.b32.xlu1 %v2153_v8, %s4757_s22  ;;  %v370_v8 = vpop.permute.xlu0 %369 }
 0x341   : > { %v2125_v15 = vmul.f32 0.02, %v4367_v12  ;;  %v4369_v2 = vadd.f32 %v2064_v14, %v350_v55  ;;  %v2066_v40 = vpop.f32.mrb[7].mxu0  ;;  %2171 = vrot.lane.b32.xlu0 %v2154_v11, %s4757_s22  ;;  %vm2109_vm13 = vcmp.ge.f32.partialorder %v4367_v12, 0.0 }
 0x342   : > { %v2126_v16 = vmul.f32 0.02, %v4368_v13  ;;  %v4370_v56 = vadd.f32 %v2066_v40, %v350_v55  ;;  %vm2110_vm1 = vcmp.ge.f32.partialorder %v4368_v13, 0.0 }
 0x343   : > { %vm2111_vm0 = vcmp.ge.f32.partialorder %v4369_v2, 0.0  ;;  %v2127_v17 = vmul.f32 0.02, %v4369_v2  ;;  %v2141_v60 = vsel %vm2109_vm13, %v4367_v12, %v2125_v15 }
 0x344   : > { %vm2112_vm3 = vcmp.ge.f32.partialorder %v4370_v56, 0.0  ;;  %v2128_v18 = vmul.f32 0.02, %v4370_v56  ;;  %v2142_v61 = vsel %vm2110_vm1, %v4368_v13, %v2126_v16 }
 0x345   : > { %v2143_v19 = vsel %vm2111_vm0, %v4369_v2, %v2127_v17 }
 0x346   : > { %v2155_v39 = vpack.c.bf16 %v2143_v19, %v2141_v60  ;;  %v2144_v63 = vsel %vm2112_vm3, %v4370_v56, %v2128_v18  ;;  %v2070_v22 = vpop.f32.mrb[8].mxu0 }
 0x347   : > { %v2156_v24 = vpack.c.bf16 %v2144_v63, %v2142_v61  ;;  %v4371_v25 = vadd.f32 %v2070_v22, %v355_v21  ;;  %v2072_v26 = vpop.f32.mrb[9].mxu0 }
 0x348   : > { %v4372_v28 = vadd.f32 %v2072_v26, %v355_v21  ;;  %v2074_v29 = vpop.f32.mrb[10].mxu0  ;;  %2173 = vrot.lane.b32.xlu1 %v2155_v39, %s4757_s22 }
 0x349   : > { %v2129_v31 = vmul.f32 0.02, %v4371_v25  ;;  %v4373_v32 = vadd.f32 %v2074_v29, %v360_v5  ;;  %v2076_v33 = vpop.f32.mrb[11].mxu0  ;;  %2175 = vrot.lane.b32.xlu0 %v2156_v24, %s4757_s22  ;;  %vm2113_vm13 = vcmp.ge.f32.partialorder %v4371_v25, 0.0 }
 0x34a   : > { %v2130_v36 = vmul.f32 0.02, %v4372_v28  ;;  %v4374_v37 = vadd.f32 %v2076_v33, %v360_v5  ;;  %vm2114_vm1 = vcmp.ge.f32.partialorder %v4372_v28, 0.0 }
 0x34b   : > { %vm2115_vm0 = vcmp.ge.f32.partialorder %v4373_v32, 0.0  ;;  %v2131_v38 = vmul.f32 0.02, %v4373_v32  ;;  %v2145_v44 = vsel %vm2113_vm13, %v4371_v25, %v2129_v31 }
 0x34c   : > { %vm2116_vm3 = vcmp.ge.f32.partialorder %v4374_v37, 0.0  ;;  %v2132_v43 = vmul.f32 0.02, %v4374_v37  ;;  %v2146_v58 = vsel %vm2114_vm1, %v4372_v28, %v2130_v36 }
 0x34d   : > { %v2147_v45 = vsel %vm2115_vm0, %v4373_v32, %v2131_v38 }
 0x34e   : > { %v2157_v62 = vpack.c.bf16 %v2147_v45, %v2145_v44  ;;  %v2148_v47 = vsel %vm2116_vm3, %v4374_v37, %v2132_v43  ;;  %v2080_v0 = vpop.f32.mrb[12].mxu0 }
 0x34f   : > { %v2158_v3 = vpack.c.bf16 %v2148_v47, %v2146_v58  ;;  %v4375_v7 = vadd.f32 %v2080_v0, %v365_v46  ;;  %v2082_v52 = vpop.f32.mrb[13].mxu0  ;;  %v4713_v0 = vld [vmem:[%s6292_s2 + $0x8] sm:$0xff]  }
 0x350   : > { %v4376_v50 = vadd.f32 %v2082_v52, %v365_v46  ;;  %v2084_v10 = vpop.f32.mrb[14].mxu0  ;;  %2177 = vrot.lane.b32.xlu1 %v2157_v62, %s4757_s22  ;;  %v4712_v62 = vld [vmem:[%s6292_s2] sm:$0xff]  }
 0x351   : > { %v2133_v11 = vmul.f32 0.02, %v4375_v7  ;;  %v4377_v12 = vadd.f32 %v2084_v10, %v370_v8  ;;  %v2086_v53 = vpop.f32.mrb[15].mxu0  ;;  %2179 = vrot.lane.b32.xlu0 %v2158_v3, %s4757_s22  ;;  %vm2117_vm13 = vcmp.ge.f32.partialorder %v4375_v7, 0.0 }
 0x352   : > { %v2134_v55 = vmul.f32 0.02, %v4376_v50  ;;  %v4378_v13 = vadd.f32 %v2086_v53, %v370_v8  ;;  %vm2118_vm1 = vcmp.ge.f32.partialorder %v4376_v50, 0.0 }
 0x353   : > { %vm2119_vm0 = vcmp.ge.f32.partialorder %v4377_v12, 0.0  ;;  %v2135_v14 = vmul.f32 0.02, %v4377_v12  ;;  %v2149_v2 = vsel %vm2117_vm13, %v4375_v7, %v2133_v11 }
 0x354   : > { %vm2120_vm3 = vcmp.ge.f32.partialorder %v4378_v13, 0.0  ;;  %v2136_v15 = vmul.f32 0.02, %v4378_v13  ;;  %v2150_v16 = vsel %vm2118_vm1, %v4376_v50, %v2134_v55  ;;  %v4714_v50 = vld [vmem:[%s6292_s2 + $0x10] sm:$0xff]   ;;  %v4715_v55 = vld [vmem:[%s6292_s2 + $0x18] sm:$0xff]   ;;  %vm6330_vm1 = vcmask 1039360  }
 0x355   : > { %v2151_v40 = vsel %vm2119_vm0, %v4377_v12, %v2135_v14  ;;  %vm6331_vm0 = vmmov %vm6330_vm1 }
 0x356   : > { %v2159_v56 = vpack.c.bf16 %v2151_v40, %v2149_v2  ;;  %v2152_v17 = vsel %vm2120_vm3, %v4378_v13, %v2136_v15 }
 0x357   : > { %v2160_v18 = vpack.c.bf16 %v2152_v17, %v2150_v16 }
 0x358   : > { %2181 = vrot.lane.b32.xlu1 %v2159_v56, %s4757_s22 }
 0x359   : > { %2183 = vrot.lane.b32.xlu0 %v2160_v18, %s4757_s22 }
 0x3b2   : > { %v2170_v60 = vpop.permute.xlu1 %2169 }
 0x3b3   : > { %2201 = vst.msk [vmem:[#allocation2] sm:$0xff] %vm310_vm7, %v2170_v60  ;;  %v2172_v19 = vpop.permute.xlu0 %2171 }
 0x3b4   : > { %v5611_v21 = vsel %vm293_vm8, %v2170_v60, %v2172_v19  ;;  %2203 = vst.msk [vmem:[#allocation2 + $0x10] sm:$0xff] %vm293_vm8, %v2172_v19 }
 0x3b5   : > { %4223 = vmatprep.subr.msk.bf16.mxu1 %vm395_vm9, %v5611_v21  ;;  %v2602_v42 = vsel %vm750_vm15, %v5611_v21, 0  ;;  %v2796_v9 = vsel %vm954_vm4, %v5611_v21, 0 }
 0x3ba   : > { %v2174_v61 = vpop.permute.xlu1 %2173  ;;  %v5617_v39 = vld [vmem:[#allocation2] sm:$0xff] }
 0x3bb   : > { %2204 = vst.msk [vmem:[#allocation2 + $0x18] sm:$0xff] %vm310_vm7, %v2174_v61  ;;  %2460 = vrot.lane.b32.xlu1 %v5617_v39, %s4760_s25  ;;  %v2176_v63 = vpop.permute.xlu0 %2175  ;;  %v5622_v22 = vld [vmem:[#allocation2 + $0x10] sm:$0xff]  ;;  %v2270_v24 = vsel %vm394_vm10, %v5617_v39, 0  ;;  %v2601_v47 = vsel %vm749_vm12, %v5617_v39, 0 }
 0x3bc   : > { %v5628_v25 = vsel %vm293_vm8, %v2174_v61, %v2176_v63  ;;  %2206 = vst.msk [vmem:[#allocation2 + $0x28] sm:$0xff] %vm293_vm8, %v2176_v63  ;;  %2464 = vrot.lane.b32.xlu0 %v5622_v22, %s4760_s25  ;;  %2319 = vmatpush1.bf16.msra.mxu1 %v2270_v24  ;;  %v2603_v41 = vsel %vm751_vm14, %v5622_v22, 0  ;;  %v2797_v6 = vsel %vm955_vm2, %v5622_v22, 0 }
 0x3bd   : > { %4224 = vmatprep.subr.msk.bf16.mxu1 %vm395_vm9, %v5628_v25  ;;  %v2605_v3 = vsel %vm750_vm15, %v5628_v25, 0  ;;  %v2799_v14 = vsel %vm954_vm4, %v5628_v25, 0  ;;  %v3163_v19 = vsel %vm1329_vm5, %v5628_v25, 0 }
 0x3bf   : > { %2462 = vrot.lane.b32.xlu1 %v5611_v21, %s4760_s25 }
 0x3c2   : > { %v2178_v26 = vpop.permute.xlu1 %2177  ;;  %v5638_v5 = vld [vmem:[#allocation2 + $0x18] sm:$0xff] }
 0x3c3   : > { %2207 = vst.msk [vmem:[#allocation2 + $0x30] sm:$0xff] %vm310_vm7, %v2178_v26  ;;  %2466 = vrot.lane.b32.xlu0 %v5638_v5, %s4760_s25  ;;  %v2180_v28 = vpop.permute.xlu0 %2179  ;;  %v5643_v29 = vld [vmem:[#allocation2 + $0x28] sm:$0xff]  ;;  %v2272_v31 = vsel %vm394_vm10, %v5638_v5, 0  ;;  %v2604_v52 = vsel %vm749_vm12, %v5638_v5, 0 }
 0x3c4   : > { %v5649_v32 = vsel %vm293_vm8, %v2178_v26, %v2180_v28  ;;  %2209 = vst.msk [vmem:[#allocation2 + $0x40] sm:$0xff] %vm293_vm8, %v2180_v28  ;;  %2470 = vrot.lane.b32.xlu1 %v5643_v29, %s4760_s25  ;;  %2321 = vmatpush1.bf16.msra.mxu1 %v2272_v31  ;;  %v2606_v7 = vsel %vm751_vm14, %v5643_v29, 0  ;;  %v2800_v15 = vsel %vm955_vm2, %v5643_v29, 0 }
 0x3c5   : > { %4225 = vmatprep.subr.msk.bf16.mxu1 %vm395_vm9, %v5649_v32  ;;  %v2608_v8 = vsel %vm750_vm15, %v5649_v32, 0  ;;  %v2802_v40 = vsel %vm954_vm4, %v5649_v32, 0  ;;  %v3166_v24 = vsel %vm1329_vm5, %v5649_v32, 0 }
 0x3c7   : > { %2468 = vrot.lane.b32.xlu0 %v5628_v25, %s4760_s25 }
 0x3ca   : > { %v2182_v33 = vpop.permute.xlu1 %2181  ;;  %v5659_v36 = vld [vmem:[#allocation2 + $0x30] sm:$0xff] }
 0x3cb   : > { %2210 = vst.msk [vmem:[#allocation2 + $0x48] sm:$0xff] %vm310_vm7, %v2182_v33  ;;  %2472 = vrot.lane.b32.xlu1 %v5659_v36, %s4760_s25  ;;  %v2184_v37 = vpop.permute.xlu0 %2183  ;;  %v5664_v38 = vld [vmem:[#allocation2 + $0x40] sm:$0xff]  ;;  %v2274_v43 = vsel %vm394_vm10, %v5659_v36, 0  ;;  %v2607_v11 = vsel %vm749_vm12, %v5659_v36, 0  ;;  %vm6320_vm7 = vcmp.ne.s16.totalorder %v5049_v20, 0  ;;  %v3160_v20 = vsel %vm1329_vm5, %v5611_v21, 0 }
 0x3cc   : > { %v5670_v44 = vsel %vm293_vm8, %v2182_v33, %v2184_v37  ;;  %2212 = vst.msk [vmem:[#allocation2 + $0x58] sm:$0xff] %vm293_vm8, %v2184_v37  ;;  %2476 = vrot.lane.b32.xlu0 %v5664_v38, %s4760_s25  ;;  %2323 = vmatpush1.bf16.msra.mxu1 %v2274_v43  ;;  %v2609_v10 = vsel %vm751_vm14, %v5664_v38, 0  ;;  %v2795_v4 = vsel %vm6320_vm7, %v5617_v39, 0  ;;  %vm6321_vm8 = vmmov %vm6320_vm7  ;;  %v2803_v16 = vsel %vm955_vm2, %v5664_v38, 0 }
 0x3cd   : > { %4226 = vmatprep.subr.msk.bf16.mxu1 %vm395_vm9, %v5670_v44  ;;  %v2611_v12 = vsel %vm750_vm15, %v5670_v44, 0  ;;  %v2798_v2 = vsel %vm6321_vm8, %v5638_v5, 0  ;;  %vm6322_vm9 = vmmov %vm6320_vm7  ;;  %v2805_v17 = vsel %vm954_vm4, %v5670_v44, 0  ;;  %v3169_v33 = vsel %vm1329_vm5, %v5670_v44, 0 }
 0x3ce   : > { %v2801_v56 = vsel %vm6322_vm9, %v5659_v36, 0  ;;  %vm6334_vm5 = vcmp.ne.s16.totalorder %v5278_v59, 0  ;;  %vm6335_vm8 = vcmp.ne.s16.totalorder %v5274_v54, 0  ;;  %vm6336_vm9 = vmmov %vm6331_vm0 }
 0x3cf   : > { %2474 = vrot.lane.b32.xlu1 %v5649_v32, %s4760_s25 }
 0x3d0   : > { %2480 = vrot.lane.b32.xlu0 %v5670_v44, %s4760_s25 }
 0x3d2   : > { %v5682_v45 = vld [vmem:[#allocation2 + $0x48] sm:$0xff] }
 0x3d3   : > { %v5684_v46 = vld [vmem:[#allocation2 + $0x58] sm:$0xff]  ;;  %v2276_v58 = vsel %vm394_vm10, %v5682_v45, 0  ;;  %v2610_v13 = vsel %vm749_vm12, %v5682_v45, 0  ;;  %vm6323_vm10 = vmmov %vm6320_vm7  ;;  %vm6324_vm12 = vcmp.ne.s16.totalorder %v5184_v48, 0  ;;  %v3355_v48 = vsel %vm6335_vm8, %v5622_v22, 0 }
 0x3d4   : > { %2482 = vrot.lane.b32.xlu1 %v5684_v46, %s4760_s25  ;;  %2325 = vmatpush1.bf16.msra.mxu1 %v2276_v58  ;;  %v2612_v53 = vsel %vm751_vm14, %v5684_v46, 0  ;;  %v2806_v18 = vsel %vm955_vm2, %v5684_v46, 0  ;;  %v2804_v60 = vsel %vm6323_vm10, %v5682_v45, 0  ;;  %v3161_v23 = vsel %vm6324_vm12, %v5622_v22, 0  ;;  %vm6326_vm15 = vmmov %vm6324_vm12 }
 0x3d5   : > { %2478 = vrot.lane.b32.xlu0 %v5682_v45, %s4760_s25  ;;  %vm6325_vm14 = vcmp.ne.s16.totalorder %v5193_v51, 0  ;;  %v3164_v61 = vsel %vm6326_vm15, %v5643_v29, 0  ;;  %vm6328_vm4 = vmmov %vm6324_vm12  ;;  %vm6338_vm12 = vcmp.ne.s16.totalorder %v5272_v49, 0  ;;  %v4717_v49 = vld [vmem:[%s6292_s2 + $0x28] sm:$0xff]  }
 0x3d6   : > { %v3159_v27 = vsel %vm6325_vm14, %v5617_v39, 0  ;;  %vm6327_vm2 = vmmov %vm6325_vm14  ;;  %v3167_v26 = vsel %vm6328_vm4, %v5664_v38, 0 }
 0x3d7   : > { %4227 = vmatmul.mubr.msk.bf16.vlgmr.msra.gmra.mrb[0].mxu1 %vm432_vm11, %v4712_v62  ;;  %v3162_v63 = vsel %vm6327_vm2, %v5638_v5, 0  ;;  %vm6329_vm13 = vmmov %vm6327_vm2 }
 0x3d8   : > { %2656 = vrot.lane.b32.xlu1 %v2602_v42, %s4761_s30  ;;  %2360 = vmatprep.mubr.bf16.mxu1 %v4756_v1  ;;  %v3165_v31 = vsel %vm6329_vm13, %v5659_v36, 0  ;;  %vm6332_vm3 = vmmov %vm6328_vm4 }
 0x3d9   : > { %2658 = vrot.lane.b32.xlu0 %v2603_v41, %s4761_s30  ;;  %v3170_v42 = vsel %vm6332_vm3, %v5684_v46, 0  ;;  %vm6333_vm7 = vmmov %vm6327_vm2 }
 0x3da   : > { %v3168_v57 = vsel %vm6333_vm7, %v5682_v45, 0  ;;  %vm6337_vm10 = vmmov %vm6331_vm0 }
 0x3db   : > { %vm6339_vm14 = vmmov %vm6334_vm5 }
 0x3dc   : > { %2654 = vrot.lane.b32.xlu1 %v2601_v47, %s4761_s30  ;;  %v3354_v47 = vsel %vm6334_vm5, %v5611_v21, 0  ;;  %vm6340_vm15 = vmmov %vm6335_vm8 }
 0x3dd   : > { %2662 = vrot.lane.b32.xlu0 %v2605_v3, %s4761_s30  ;;  %vm6341_vm2 = vmmov %vm6338_vm12 }
 0x3de   : > { %vm6342_vm4 = vmmov %vm6331_vm0 }
 0x3df   : > { %4228 = vmatmul.mubr.msk.bf16.gmra.mrb[4].mxu1 %vm432_vm11, %v4713_v0  ;;  %vm6343_vm13 = vmmov %vm6331_vm0 }
 0x3e0   : > { %2664 = vrot.lane.b32.xlu1 %v2606_v7, %s4761_s30  ;;  %2370 = vmatprep.mubr.bf16.mxu1 %v4756_v1  ;;  %vm6346_vm3 = vmmov %vm6341_vm2 }
 0x3e1   : > { %2660 = vrot.lane.b32.xlu0 %v2604_v52, %s4761_s30  ;;  %v3353_v52 = vsel %vm6338_vm12, %v5617_v39, 0  ;;  %vm6347_vm7 = vmmov %vm6342_vm4  ;;  %vm6352_vm12 = vcmask 1031168  }
 0x3e4   : > { %2668 = vrot.lane.b32.xlu1 %v2608_v8, %s4761_s30  ;;  %v3357_v8 = vsel %vm6339_vm14, %v5628_v25, 0  ;;  %vm6353_vm14 = vmmov %vm6352_vm12 }
 0x3e5   : > { %2670 = vrot.lane.b32.xlu0 %v2609_v10, %s4761_s30 }
 0x3e7   : > { %4229 = vmatmul.mubr.msk.bf16.gmra.mrb[8].mxu1 %vm432_vm11, %v4714_v50 }
 0x3e8   : > { %2666 = vrot.lane.b32.xlu1 %v2607_v11, %s4761_s30  ;;  %2380 = vmatprep.mubr.bf16.mxu1 %v4756_v1  ;;  %v3358_v11 = vsel %vm6340_vm15, %v5643_v29, 0  ;;  %vm6354_vm15 = vmmov %vm6352_vm12 }
 0x3e9   : > { %2674 = vrot.lane.b32.xlu0 %v2611_v12, %s4761_s30  ;;  %v3356_v12 = vsel %vm6341_vm2, %v5638_v5, 0 }
 0x3ec   : > { %2676 = vrot.lane.b32.xlu1 %v2612_v53, %s4761_s30 }
 0x3ed   : > { %2672 = vrot.lane.b32.xlu0 %v2610_v13, %s4761_s30 }
 0x3ef   : > { %4230 = vmatmul.mubr.msk.bf16.gmra.mrb[12].mxu1 %vm432_vm11, %v4715_v55 }
 0x3f0   : > { %2850 = vrot.lane.b32.xlu1 %v2796_v9, %s4762_s9  ;;  %2544 = vmatprep.mubr.bf16.mxu1 %v4756_v1 }
 0x3f1   : > { %2852 = vrot.lane.b32.xlu0 %v2797_v6, %s4762_s9 }
 0x3f4   : > { %2848 = vrot.lane.b32.xlu1 %v2795_v4, %s4762_s9 }
 0x3f5   : > { %2856 = vrot.lane.b32.xlu0 %v2799_v14, %s4762_s9 }
 0x3f8   : > { %2858 = vrot.lane.b32.xlu1 %v2800_v15, %s4762_s9  ;;  %v3359_v15 = vsel %vm6346_vm3, %v5659_v36, 0  ;;  %vm6360_vm3 = vcmask 916480  }
 0x3f9   : > { %2854 = vrot.lane.b32.xlu0 %v2798_v2, %s4762_s9 }
 0x3fc   : > { %2862 = vrot.lane.b32.xlu1 %v2802_v40, %s4762_s9 }
 0x3fd   : > { %2864 = vrot.lane.b32.xlu0 %v2803_v16, %s4762_s9 }
 0x400   : > { %2860 = vrot.lane.b32.xlu1 %v2801_v56, %s4762_s9 }
 0x401   : > { %2868 = vrot.lane.b32.xlu0 %v2805_v17, %s4762_s9  ;;  %v4716_v17 = vld [vmem:[%s6292_s2 + $0x20] sm:$0xff]  }
 0x404   : > { %2870 = vrot.lane.b32.xlu1 %v2806_v18, %s4762_s9 }
 0x405   : > { %2866 = vrot.lane.b32.xlu0 %v2804_v60, %s4762_s9 }
 0x408   : > { %3020 = vrot.lane.b32.xlu1 %v5611_v21, %s4764_s11 }
 0x409   : > { %3022 = vrot.lane.b32.xlu0 %v5622_v22, %s4764_s11 }
 0x40c   : > { %3018 = vrot.lane.b32.xlu1 %v5617_v39, %s4764_s11 }
 0x40d   : > { %3026 = vrot.lane.b32.xlu0 %v5628_v25, %s4764_s11 }
 0x410   : > { %3028 = vrot.lane.b32.xlu1 %v5643_v29, %s4764_s11 }
 0x411   : > { %3024 = vrot.lane.b32.xlu0 %v5638_v5, %s4764_s11 }
 0x414   : > { %3032 = vrot.lane.b32.xlu1 %v5649_v32, %s4764_s11 }
 0x415   : > { %3034 = vrot.lane.b32.xlu0 %v5664_v38, %s4764_s11 }
 0x418   : > { %3030 = vrot.lane.b32.xlu1 %v5659_v36, %s4764_s11 }
 0x419   : > { %3038 = vrot.lane.b32.xlu0 %v5670_v44, %s4764_s11 }
 0x41c   : > { %3040 = vrot.lane.b32.xlu1 %v5684_v46, %s4764_s11 }
 0x41d   : > { %3036 = vrot.lane.b32.xlu0 %v5682_v45, %s4764_s11 }
 0x420   : > { %3214 = vrot.lane.b32.xlu1 %v3160_v20, %s4766_s27 }
 0x421   : > { %3216 = vrot.lane.b32.xlu0 %v3161_v23, %s4766_s27 }
 0x424   : > { %3212 = vrot.lane.b32.xlu1 %v3159_v27, %s4766_s27 }
 0x425   : > { %3220 = vrot.lane.b32.xlu0 %v3163_v19, %s4766_s27 }
 0x428   : > { %3222 = vrot.lane.b32.xlu1 %v3164_v61, %s4766_s27 }
 0x429   : > { %3218 = vrot.lane.b32.xlu0 %v3162_v63, %s4766_s27 }
 0x42c   : > { %3226 = vrot.lane.b32.xlu1 %v3166_v24, %s4766_s27 }
 0x42d   : > { %v2461_v28 = vpop.permute.xlu1 %2460  ;;  %3228 = vrot.lane.b32.xlu0 %v3167_v26, %s4766_s27 }
 0x42e   : > { %v2465_v37 = vpop.permute.xlu0 %2464 }
 0x430   : > { %3224 = vrot.lane.b32.xlu1 %v3165_v31, %s4766_s27 }
 0x431   : > { %v2463_v43 = vpop.permute.xlu1 %2462  ;;  %3232 = vrot.lane.b32.xlu0 %v3169_v33, %s4766_s27 }
 0x432   : > { %v2485_v58 = vsel %vm6330_vm1, %v2463_v43, %v2465_v37  ;;  %v2484_v62 = vsel %vm6331_vm0, %v2461_v28, %v2463_v43  ;;  %vm6344_vm1 = vmmov %vm6334_vm5  ;;  %v4718_v37 = vld [vmem:[%s6292_s2 + $0x30] sm:$0xff]  }
 0x433   : > { %2512 = vmatprep.subr.bf16.mxu1 %v2485_v58  ;;  %v3360_v6 = vsel %vm6344_vm1, %v5649_v32, 0  ;;  %vm6345_vm0 = vmmov %vm6335_vm8 }
 0x434   : > { %3234 = vrot.lane.b32.xlu1 %v3170_v42, %s4766_s27  ;;  %2513 = vmatpush1.bf16.msra.mxu1 %v2484_v62  ;;  %v3361_v4 = vsel %vm6345_vm0, %v5664_v38, 0  ;;  %vm6348_vm5 = vmmov %vm6342_vm4 }
 0x435   : > { %v2467_v41 = vpop.permute.xlu0 %2466  ;;  %3230 = vrot.lane.b32.xlu0 %v3168_v57, %s4766_s27  ;;  %vm6349_vm8 = vmmov %vm6344_vm1 }
 0x436   : > { %v2471_v0 = vpop.permute.xlu1 %2470  ;;  %v3363_v56 = vsel %vm6349_vm8, %v5670_v44, 0  ;;  %vm6363_vm8 = vmmov %vm6360_vm3 }
 0x438   : > { %3408 = vrot.lane.b32.xlu1 %v3354_v47, %s4767_s13 }
 0x439   : > { %v2469_v3 = vpop.permute.xlu0 %2468  ;;  %3410 = vrot.lane.b32.xlu0 %v3355_v48, %s4767_s13  ;;  %v4719_v48 = vld [vmem:[%s6292_s2 + $0x38] sm:$0xff]  }
 0x43a   : > { %v2487_v51 = vsel %vm6336_vm9, %v2469_v3, %v2471_v0  ;;  %v2486_v7 = vsel %vm6337_vm10, %v2467_v41, %v2469_v3  ;;  %vm6350_vm9 = vmmov %vm6345_vm0 }
 0x43b   : > { %2514 = vmatprep.subr.bf16.mxu1 %v2487_v51  ;;  %v3364_v60 = vsel %vm6350_vm9, %v5684_v46, 0  ;;  %vm6351_vm10 = vmmov %vm6341_vm2 }
 0x43c   : > { %3406 = vrot.lane.b32.xlu1 %v3353_v52, %s4767_s13  ;;  %2515 = vmatpush1.bf16.msra.mxu1 %v2486_v7  ;;  %v3362_v59 = vsel %vm6351_vm10, %v5682_v45, 0  ;;  %vm6355_vm2 = vmmov %vm6352_vm12  ;;  %v3718_v52 = vsel %vm1908_vm6, %v5611_v21, 0 }
 0x43d   : > { %v2473_v50 = vpop.permute.xlu1 %2472  ;;  %3414 = vrot.lane.b32.xlu0 %v3357_v8, %s4767_s13  ;;  %vm6358_vm1 = vmmov %vm6355_vm2 }
 0x43e   : > { %v2477_v10 = vpop.permute.xlu0 %2476  ;;  %vm6359_vm0 = vmmov %vm6358_vm1 }
 0x43f   : > { %vm6364_vm9 = vmmov %vm6360_vm3 }
 0x440   : > { %3416 = vrot.lane.b32.xlu1 %v3358_v11, %s4767_s13 }
 0x441   : > { %v2475_v53 = vpop.permute.xlu1 %2474  ;;  %3412 = vrot.lane.b32.xlu0 %v3356_v12, %s4767_s13 }
 0x442   : > { %v2488_v55 = vsel %vm6342_vm4, %v2473_v50, %v2475_v53  ;;  %v2489_v13 = vsel %vm6343_vm13, %v2475_v53, %v2477_v10  ;;  %v2481_v9 = vpop.permute.xlu0 %2480  ;;  %vm6356_vm4 = vmmov %vm6355_vm2  ;;  %v4720_v10 = vld [vmem:[%s6292_s2 + $0x40] sm:$0xff]  }
 0x443   : > { %2516 = vmatprep.subr.bf16.mxu1 %v2489_v13  ;;  %vm6357_vm13 = vmmov %vm6355_vm2 }
 0x444   : > { %3420 = vrot.lane.b32.xlu1 %v3360_v6, %s4767_s13  ;;  %2517 = vmatpush1.bf16.msra.mxu1 %v2488_v55 }
 0x445   : > { %3422 = vrot.lane.b32.xlu0 %v3361_v4, %s4767_s13 }
 0x446   : > { %v2483_v14 = vpop.permute.xlu1 %2482 }
 0x447   : > { %v2491_v2 = vsel %vm6347_vm7, %v2481_v9, %v2483_v14  ;;  %v2479_v40 = vpop.permute.xlu0 %2478  ;;  %vm6361_vm7 = vcmp.ne.s16.totalorder %v5428_v34, 0  ;;  %v4721_v14 = vld [vmem:[%s6292_s2 + $0x48] sm:$0xff]  }
 0x448   : > { %3418 = vrot.lane.b32.xlu1 %v3359_v15, %s4767_s13  ;;  %2518 = vmatprep.subr.bf16.mxu1 %v2491_v2  ;;  %v2490_v16 = vsel %vm6348_vm5, %v2479_v40, %v2481_v9  ;;  %v3719_v50 = vsel %vm6361_vm7, %v5622_v22, 0  ;;  %vm6362_vm5 = vcmp.ne.s16.totalorder %v5423_v30, 0  ;;  %vm6365_vm10 = vmmov %vm6361_vm7  ;;  %v3724_v2 = vsel %vm1908_vm6, %v5649_v32, 0  ;;  %v4212_v34 = vld [vmem:[%s6293_s3 + $0x48] sm:$0xff] }
 0x449   : > { %3426 = vrot.lane.b32.xlu0 %v3363_v56, %s4767_s13  ;;  %2519 = vmatpush1.bf16.msra.mxu1 %v2490_v16  ;;  %v3717_v12 = vsel %vm6362_vm5, %v5617_v39, 0 }
 0x44a   : > { %v2657_v18 = vpop.permute.xlu1 %2656 }
 0x44b   : > { %v2659_v20 = vpop.permute.xlu0 %2658 }
 0x44c   : > { %3428 = vrot.lane.b32.xlu1 %v3364_v60, %s4767_s13  ;;  %4243 = vmatmul.mubr.msk.bf16.vlgmr.msra.gmra.mrb[0].mxu1 %vm432_vm11, %v4716_v17  ;;  %v2679_v23 = vsel %vm6352_vm12, %v2657_v18, %v2659_v20  ;;  %vm6366_vm12 = vmmov %vm6362_vm5  ;;  %v4722_v60 = vld [vmem:[%s6292_s2 + $0x50] sm:$0xff]  }
 0x44d   : > { %3424 = vrot.lane.b32.xlu0 %v3362_v59, %s4767_s13  ;;  %2706 = vmatprep.subr.bf16.mxu1 %v2679_v23  ;;  %v4211_v23 = vld [vmem:[%s6293_s3 + $0x40] sm:$0xff] }
 0x44e   : > { %v2655_v27 = vpop.permute.xlu1 %2654  ;;  %2554 = vmatprep.mubr.bf16.mxu1 %v4756_v1 }
 0x44f   : > { %v2678_v54 = vsel %vm6353_vm14, %v2655_v27, %v2657_v18  ;;  %v2663_v19 = vpop.permute.xlu0 %2662  ;;  %vm6367_vm14 = vmmov %vm6360_vm3  ;;  %v3727_v18 = vsel %vm1908_vm6, %v5670_v44, 0 }
 0x450   : > { %3578 = vrot.lane.b32.xlu1 %v5611_v21, %s4769_s5  ;;  %2707 = vmatpush1.bf16.msra.mxu1 %v2678_v54  ;;  %v3721_v21 = vsel %vm1908_vm6, %v5628_v25, 0  ;;  %vm6376_vm6 = vcmask 908288  }
 0x451   : > { %3580 = vrot.lane.b32.xlu0 %v5622_v22, %s4769_s5 }
 0x452   : > { %v2665_v61 = vpop.permute.xlu1 %2664 }
 0x453   : > { %v2681_v63 = vsel %vm6354_vm15, %v2663_v19, %v2665_v61  ;;  %v2661_v24 = vpop.permute.xlu0 %2660  ;;  %vm6368_vm15 = vmmov %vm6360_vm3  ;;  %v4215_v61 = vld [vmem:[%s6293_s3 + $0x60] sm:$0xff] }
 0x454   : > { %3576 = vrot.lane.b32.xlu1 %v5617_v39, %s4769_s5  ;;  %2708 = vmatprep.subr.bf16.mxu1 %v2681_v63  ;;  %v2680_v26 = vsel %vm6355_vm2, %v2661_v24, %v2663_v19  ;;  %v3722_v39 = vsel %vm6365_vm10, %v5643_v29, 0  ;;  %vm6369_vm2 = vmmov %vm6360_vm3  ;;  %v4214_v19 = vld [vmem:[%s6293_s3 + $0x58] sm:$0xff]  ;;  %v4216_v24 = vld [vmem:[%s6293_s3 + $0x68] sm:$0xff] }
 0x455   : > { %4244 = vmatmul.mubr.msk.bf16.gmra.mrb[4].mxu1 %vm432_vm11, %v4717_v49  ;;  %3584 = vrot.lane.b32.xlu0 %v5628_v25, %s4769_s5  ;;  %v3720_v25 = vsel %vm6366_vm12, %v5638_v5, 0 }
 0x456   : > { %v2669_v28 = vpop.permute.xlu1 %2668  ;;  %2709 = vmatpush1.bf16.msra.mxu1 %v2680_v26  ;;  %2564 = vmatprep.mubr.bf16.mxu1 %v4756_v1 }
 0x457   : > { %v2671_v31 = vpop.permute.xlu0 %2670 }
 0x458   : > { %3586 = vrot.lane.b32.xlu1 %v5643_v29, %s4769_s5  ;;  %v2683_v33 = vsel %vm6356_vm4, %v2669_v28, %v2671_v31  ;;  %vm6370_vm4 = vmmov %vm6361_vm7  ;;  %v4724_v31 = vld [vmem:[%s6292_s2 + $0x60] sm:$0xff]  }
 0x459   : > { %3582 = vrot.lane.b32.xlu0 %v5638_v5, %s4769_s5  ;;  %2710 = vmatprep.subr.bf16.mxu1 %v2683_v33  ;;  %v3725_v40 = vsel %vm6370_vm4, %v5664_v38, 0  ;;  %vm6375_vm7 = vmmov %vm6362_vm5 }
 0x45a   : > { %v2667_v43 = vpop.permute.xlu1 %2666  ;;  %v3726_v35 = vsel %vm6375_vm7, %v5682_v45, 0 }
 0x45b   : > { %v2682_v58 = vsel %vm6357_vm13, %v2667_v43, %v2669_v28  ;;  %v2675_v62 = vpop.permute.xlu0 %2674  ;;  %vm6371_vm13 = vmmov %vm6362_vm5  ;;  %v4217_v28 = vld [vmem:[%s6293_s3 + $0x70] sm:$0xff] }
 0x45c   : > { %3590 = vrot.lane.b32.xlu1 %v5649_v32, %s4769_s5  ;;  %2711 = vmatpush1.bf16.msra.mxu1 %v2682_v58  ;;  %v3723_v32 = vsel %vm6371_vm13, %v5659_v36, 0  ;;  %vm6377_vm5 = vmmov %vm6376_vm6 }
 0x45d   : > { %4245 = vmatmul.mubr.msk.bf16.gmra.mrb[8].mxu1 %vm432_vm11, %v4718_v37  ;;  %3592 = vrot.lane.b32.xlu0 %v5664_v38, %s4769_s5  ;;  %v4218_v37 = vld [vmem:[%s6293_s3 + $0x78] sm:$0xff]  ;;  %vm6380_vm10 = vmmov %vm6377_vm5 }
 0x45e   : > { %v2677_v42 = vpop.permute.xlu1 %2676  ;;  %2574 = vmatprep.mubr.bf16.mxu1 %v4756_v1  ;;  %vm6381_vm12 = vmmov %vm6377_vm5 }
 0x45f   : > { %v2685_v57 = vsel %vm6358_vm1, %v2675_v62, %v2677_v42  ;;  %v2673_v41 = vpop.permute.xlu0 %2672  ;;  %vm6372_vm1 = vmmov %vm6369_vm2 }
 0x460   : > { %3588 = vrot.lane.b32.xlu1 %v5659_v36, %s4769_s5  ;;  %2712 = vmatprep.subr.bf16.mxu1 %v2685_v57  ;;  %v2684_v47 = vsel %vm6359_vm0, %v2673_v41, %v2675_v62  ;;  %vm6373_vm0 = vmmov %vm6372_vm1 }
 0x461   : > { %3596 = vrot.lane.b32.xlu0 %v5670_v44, %s4769_s5  ;;  %2713 = vmatpush1.bf16.msra.mxu1 %v2684_v47  ;;  %v4725_v47 = vld [vmem:[%s6292_s2 + $0x68] sm:$0xff]  }
 0x462   : > { %v2851_v0 = vpop.permute.xlu1 %2850 }
 0x463   : > { %v2853_v3 = vpop.permute.xlu0 %2852 }
 0x464   : > { %3598 = vrot.lane.b32.xlu1 %v5684_v46, %s4769_s5  ;;  %v2873_v51 = vsel %vm6360_vm3, %v2851_v0, %v2853_v3  ;;  %vm6374_vm3 = vmmov %vm6370_vm4 }
 0x465   : > { %4246 = vmatmul.mubr.msk.bf16.gmra.mrb[12].mxu1 %vm432_vm11, %v4719_v48  ;;  %3594 = vrot.lane.b32.xlu0 %v5682_v45, %s4769_s5  ;;  %v3728_v36 = vsel %vm6374_vm3, %v5684_v46, 0  ;;  %v4213_v45 = vld [vmem:[%s6293_s3 + $0x50] sm:$0xff]  ;;  %v4723_v46 = vld [vmem:[%s6292_s2 + $0x58] sm:$0xff]  }
 0x466   : > { %v2849_v7 = vpop.permute.xlu1 %2848  ;;  %2900 = vmatprep.subr.bf16.mxu1 %v2873_v51  ;;  %2738 = vmatprep.mubr.bf16.mxu1 %v4756_v1 }
 0x467   : > { %v2857_v8 = vpop.permute.xlu0 %2856  ;;  %v2872_v55 = vsel %vm6364_vm9, %v2849_v7, %v2851_v0  ;;  %vm6379_vm9 = vmmov %vm6377_vm5 }
 0x468   : > { %3772 = vrot.lane.b32.xlu1 %v3718_v52, %s4770_s6 }
 0x469   : > { %3774 = vrot.lane.b32.xlu0 %v3719_v50, %s4770_s6 }
 0x46a   : > { %v2859_v11 = vpop.permute.xlu1 %2858 }
 0x46b   : > { %v2855_v53 = vpop.permute.xlu0 %2854  ;;  %v2875_v22 = vsel %vm6363_vm8, %v2857_v8, %v2859_v11  ;;  %vm6378_vm8 = vmmov %vm6377_vm5 }
 0x46c   : > { %3770 = vrot.lane.b32.xlu1 %v3717_v12, %s4770_s6  ;;  %v2874_v4 = vsel %vm6368_vm15, %v2855_v53, %v2857_v8  ;;  %vm6383_vm15 = vmmov %vm6377_vm5 }
 0x46d   : > { %4259 = vmatmul.mubr.msk.bf16.vlgmr.msra.gmra.mrb[0].mxu1 %vm432_vm11, %v4720_v10  ;;  %3778 = vrot.lane.b32.xlu0 %v3721_v21, %s4770_s6  ;;  %v4726_v10 = vld [vmem:[%s6292_s2 + $0x70] sm:$0xff]  }
 0x46e   : > { %v2863_v13 = vpop.permute.xlu1 %2862  ;;  %2901 = vmatpush1.bf16.msra.mxu1 %v2872_v55  ;;  %2748 = vmatprep.mubr.bf16.mxu1 %v4756_v1  ;;  %v4727_v55 = vld [vmem:[%s6292_s2 + $0x78] sm:$0xff]  }
 0x46f   : > { %2902 = vmatprep.subr.bf16.mxu1 %v2875_v22  ;;  %v2865_v9 = vpop.permute.xlu0 %2864 }
 0x470   : > { %3780 = vrot.lane.b32.xlu1 %v3722_v39, %s4770_s6  ;;  %v2877_v6 = vsel %vm6367_vm14, %v2863_v13, %v2865_v9  ;;  %vm6382_vm14 = vmmov %vm6377_vm5 }
 0x471   : > { %3776 = vrot.lane.b32.xlu0 %v3720_v25, %s4770_s6 }
 0x472   : > { %v2861_v15 = vpop.permute.xlu1 %2860  ;;  %2903 = vmatpush1.bf16.msra.mxu1 %v2874_v4 }
 0x473   : > { %v2876_v29 = vsel %vm6369_vm2, %v2861_v15, %v2863_v13  ;;  %2904 = vmatprep.subr.bf16.mxu1 %v2877_v6  ;;  %v2869_v5 = vpop.permute.xlu0 %2868  ;;  %vm6384_vm2 = vcmask 900096   ;;  %v4728_v6 = vld [vmem:[%s6292_s2 + $0x80] sm:$0xff]  }
 0x474   : > { %3784 = vrot.lane.b32.xlu1 %v3724_v2, %s4770_s6  ;;  %vm6385_vm4 = vmmov %vm6384_vm2 }
 0x475   : > { %4260 = vmatmul.mubr.msk.bf16.gmra.mrb[4].mxu1 %vm432_vm11, %v4721_v14  ;;  %3786 = vrot.lane.b32.xlu0 %v3725_v40, %s4770_s6  ;;  %vm6386_vm13 = vmmov %vm6384_vm2 }
 0x476   : > { %v2871_v16 = vpop.permute.xlu1 %2870  ;;  %2905 = vmatpush1.bf16.msra.mxu1 %v2876_v29  ;;  %2758 = vmatprep.mubr.bf16.mxu1 %v4756_v1 }
 0x477   : > { %v2879_v56 = vsel %vm6372_vm1, %v2869_v5, %v2871_v16  ;;  %v2867_v17 = vpop.permute.xlu0 %2866  ;;  %vm6387_vm1 = vmmov %vm6384_vm2 }
 0x478   : > { %3782 = vrot.lane.b32.xlu1 %v3723_v32, %s4770_s6  ;;  %2906 = vmatprep.subr.bf16.mxu1 %v2879_v56  ;;  %v2878_v38 = vsel %vm6373_vm0, %v2867_v17, %v2869_v5  ;;  %v4729_v5 = vld [vmem:[%s6292_s2 + $0x88] sm:$0xff]   ;;  %vm6388_vm0 = vmmov %vm6387_vm1 }
 0x479   : > { %3790 = vrot.lane.b32.xlu0 %v3727_v18, %s4770_s6  ;;  %vm6389_vm3 = vmmov %vm6388_vm0 }
 0x47a   : > { %v3021_v20 = vpop.permute.xlu1 %3020  ;;  %2907 = vmatpush1.bf16.msra.mxu1 %v2878_v38  ;;  %vm6390_vm7 = vmmov %vm6388_vm0 }
 0x47b   : > { %v3023_v59 = vpop.permute.xlu0 %3022 }
 0x47c   : > { %3792 = vrot.lane.b32.xlu1 %v3728_v36, %s4770_s6  ;;  %v3043_v44 = vsel %vm6376_vm6, %v3021_v20, %v3023_v59  ;;  %vm6391_vm6 = vmmov %vm6388_vm0 }
 0x47d   : > { %4261 = vmatmul.mubr.msk.bf16.gmra.mrb[8].mxu1 %vm432_vm11, %v4722_v60  ;;  %3788 = vrot.lane.b32.xlu0 %v3726_v35, %s4770_s6  ;;  %v4730_v60 = vld [vmem:[%s6292_s2 + $0x90] sm:$0xff]  }
 0x47e   : > { %v3019_v27 = vpop.permute.xlu1 %3018  ;;  %3070 = vmatprep.subr.bf16.mxu1 %v3043_v44  ;;  %2768 = vmatprep.mubr.bf16.mxu1 %v4756_v1  ;;  %v4731_v44 = vld [vmem:[%s6292_s2 + $0x98] sm:$0xff]  }
 0x47f   : > { %v3027_v30 = vpop.permute.xlu0 %3026  ;;  %v3042_v58 = vsel %vm6377_vm5, %v3019_v27, %v3021_v20  ;;  %vm6392_vm5 = vcmask 785408  }
 0x480   : > { %2224 = vperm.xlu1 %4675, %v4211_v23  }
 0x481   : > { %2229 = vperm.xlu0 %4674, %v4212_v34   ;;  %v4732_v34 = vld [vmem:[%s6292_s2 + $0xa0] sm:$0xff]  }
 0x482   : > { %v3029_v54 = vpop.permute.xlu1 %3028 }
 0x483   : > { %v3025_v49 = vpop.permute.xlu0 %3024  ;;  %v3045_v42 = vsel %vm6378_vm8, %v3027_v30, %v3029_v54  ;;  %vm6393_vm8 = vmmov %vm6392_vm5 }
 0x484   : > { %2234 = vperm.xlu1 %4675, %v4213_v45   ;;  %v3044_v41 = vsel %vm6379_vm9, %v3025_v49, %v3027_v30  ;;  %vm6394_vm9 = vmmov %vm6392_vm5 }
 0x485   : > { %4262 = vmatmul.mubr.msk.bf16.gmra.mrb[12].mxu1 %vm432_vm11, %v4723_v46  ;;  %2239 = vperm.xlu0 %4674, %v4214_v19  }
 0x486   : > { %v3033_v63 = vpop.permute.xlu1 %3032  ;;  %2932 = vmatprep.mubr.bf16.mxu1 %v4756_v1 }
 0x487   : > { %v3035_v26 = vpop.permute.xlu0 %3034 }
 0x488   : > { %2244 = vperm.xlu1 %4675, %v4215_v61   ;;  %v3047_v0 = vsel %vm6380_vm10, %v3033_v63, %v3035_v26  ;;  %vm6395_vm10 = vmmov %vm6392_vm5  ;;  %v4733_v61 = vld [vmem:[%s6292_s2 + $0xa8] sm:$0xff]  }
 0x489   : > { %2249 = vperm.xlu0 %4674, %v4216_v24  }
 0x48a   : > { %v3031_v33 = vpop.permute.xlu1 %3030 }
 0x48b   : > { %v3039_v43 = vpop.permute.xlu0 %3038  ;;  %v3046_v51 = vsel %vm6381_vm12, %v3031_v33, %v3033_v63  ;;  %vm6396_vm12 = vmmov %vm6392_vm5 }
 0x48c   : > { %2254 = vperm.xlu1 %4675, %v4217_v28  }
 0x48d   : > { %4275 = vmatmul.mubr.msk.bf16.vlgmr.msra.gmra.mrb[0].mxu1 %vm432_vm11, %v4724_v31  ;;  %2259 = vperm.xlu0 %4674, %v4218_v37  }
 0x48e   : > { %v3041_v62 = vpop.permute.xlu1 %3040  ;;  %3071 = vmatpush1.bf16.msra.mxu1 %v3042_v58  ;;  %2942 = vmatprep.mubr.bf16.mxu1 %v4756_v1 }
 0x48f   : > { %3072 = vmatprep.subr.bf16.mxu1 %v3045_v42  ;;  %v3037_v57 = vpop.permute.xlu0 %3036  ;;  %v3049_v52 = vsel %vm6382_vm14, %v3039_v43, %v3041_v62  ;;  %vm6397_vm14 = vmmov %vm6392_vm5 }
 0x490   : > { %v3048_v50 = vsel %vm6383_vm15, %v3037_v57, %v3039_v43  ;;  %vm6398_vm15 = vmmov %vm6392_vm5  ;;  %v4734_v43 = vld [vmem:[%s6292_s2 + $0xb0] sm:$0xff]   ;;  %v4735_v57 = vld [vmem:[%s6292_s2 + $0xb8] sm:$0xff]  }
 0x492   : > { %v3215_v48 = vpop.permute.xlu1 %3214  ;;  %3073 = vmatpush1.bf16.msra.mxu1 %v3044_v41 }
 0x493   : > { %3074 = vmatprep.subr.bf16.mxu1 %v3047_v0  ;;  %v3217_v3 = vpop.permute.xlu0 %3216  ;;  %v4736_v0 = vld [vmem:[%s6292_s2 + $0xc0] sm:$0xff]  }
 0x494   : > { %v3237_v12 = vsel %vm6384_vm2, %v3215_v48, %v3217_v3  ;;  %vm6399_vm2 = vmmov %vm6392_vm5 }
 0x495   : > { %4276 = vmatmul.mubr.msk.bf16.gmra.mrb[4].mxu1 %vm432_vm11, %v4725_v47 }
 0x496   : > { %v3213_v7 = vpop.permute.xlu1 %3212  ;;  %3075 = vmatpush1.bf16.msra.mxu1 %v3046_v51  ;;  %2952 = vmatprep.mubr.bf16.mxu1 %v4756_v1 }
 0x497   : > { %3076 = vmatprep.subr.bf16.mxu1 %v3049_v52  ;;  %v3221_v8 = vpop.permute.xlu0 %3220  ;;  %v3236_v4 = vsel %vm6385_vm4, %v3213_v7, %v3215_v48  ;;  %vm6400_vm4 = vcmask 777216  }
 0x49a   : > { %v3223_v11 = vpop.permute.xlu1 %3222  ;;  %3077 = vmatpush1.bf16.msra.mxu1 %v3048_v50 }
 0x49b   : > { %3264 = vmatprep.subr.bf16.mxu1 %v3237_v12  ;;  %v3219_v53 = vpop.permute.xlu0 %3218  ;;  %v3239_v15 = vsel %vm6386_vm13, %v3221_v8, %v3223_v11  ;;  %vm6401_vm13 = vmmov %vm6400_vm4 }
 0x49c   : > { %v3238_v2 = vsel %vm6387_vm1, %v3219_v53, %v3221_v8  ;;  %vm6402_vm1 = vmmov %vm6400_vm4 }
 0x49d   : > { %4277 = vmatmul.mubr.msk.bf16.gmra.mrb[8].mxu1 %vm432_vm11, %v4726_v10  ;;  %v4737_v10 = vld [vmem:[%s6292_s2 + $0xc8] sm:$0xff]  }
 0x49e   : > { %v3227_v21 = vpop.permute.xlu1 %3226  ;;  %2962 = vmatprep.mubr.bf16.mxu1 %v4756_v1 }
 0x49f   : > { %v3229_v22 = vpop.permute.xlu0 %3228 }
 0x4a0   : > { %v3241_v40 = vsel %vm6388_vm0, %v3227_v21, %v3229_v22  ;;  %vm6403_vm0 = vmmov %vm6402_vm1 }
 0x4a2   : > { %v3225_v13 = vpop.permute.xlu1 %3224 }
 0x4a3   : > { %v3233_v39 = vpop.permute.xlu0 %3232  ;;  %v3240_v32 = vsel %vm6389_vm3, %v3225_v13, %v3227_v21  ;;  %vm6404_vm3 = vmmov %vm6403_vm0  ;;  %v4738_v13 = vld [vmem:[%s6292_s2 + $0xd0] sm:$0xff]  }
 0x4a5   : > { %4278 = vmatmul.mubr.msk.bf16.gmra.mrb[12].mxu1 %vm432_vm11, %v4727_v55 }
 0x4a6   : > { %3102 = vmatprep.mubr.bf16.mxu1 %v4756_v1  ;;  %v3235_v9 = vpop.permute.xlu1 %3234 }
 0x4a7   : > { %v3231_v25 = vpop.permute.xlu0 %3230  ;;  %v3243_v17 = vsel %vm6390_vm7, %v3233_v39, %v3235_v9  ;;  %vm6405_vm7 = vmmov %vm6403_vm0 }
 0x4a8   : > { %v3242_v38 = vsel %vm6391_vm6, %v3231_v25, %v3233_v39  ;;  %vm6406_vm6 = vmmov %vm6403_vm0 }
 0x4aa   : > { %v3409_v14 = vpop.permute.xlu1 %3408 }
 0x4ab   : > { %v3411_v29 = vpop.permute.xlu0 %3410 }
 0x4ac   : > { %v3431_v20 = vsel %vm6392_vm5, %v3409_v14, %v3411_v29  ;;  %vm6407_vm5 = vmmov %vm6403_vm0  ;;  %v4740_v29 = vld [vmem:[%s6292_s2 + $0xe0] sm:$0xff]  }
 0x4ad   : > { %4291 = vmatmul.mubr.msk.bf16.vlgmr.msra.gmra.mrb[0].mxu1 %vm432_vm11, %v4728_v6 }
 0x4ae   : > { %3265 = vmatpush1.bf16.msra.mxu1 %v3236_v4  ;;  %3112 = vmatprep.mubr.bf16.mxu1 %v4756_v1  ;;  %v3407_v16 = vpop.permute.xlu1 %3406  ;;  %v4739_v4 = vld [vmem:[%s6292_s2 + $0xd8] sm:$0xff]  }
 0x4af   : > { %3266 = vmatprep.subr.bf16.mxu1 %v3239_v15  ;;  %v3415_v56 = vpop.permute.xlu0 %3414  ;;  %v3430_v45 = vsel %vm6393_vm8, %v3407_v16, %v3409_v14  ;;  %vm6408_vm8 = vcmask 769024  }
 0x4b2   : > { %3267 = vmatpush1.bf16.msra.mxu1 %v3238_v2  ;;  %v3417_v18 = vpop.permute.xlu1 %3416 }
 0x4b3   : > { %3268 = vmatprep.subr.bf16.mxu1 %v3241_v40  ;;  %v3413_v36 = vpop.permute.xlu0 %3412  ;;  %v3433_v54 = vsel %vm6394_vm9, %v3415_v56, %v3417_v18  ;;  %vm6409_vm9 = vmmov %vm6408_vm8 }
 0x4b4   : > { %v3432_v19 = vsel %vm6395_vm10, %v3413_v36, %v3415_v56  ;;  %vm6410_vm10 = vmmov %vm6408_vm8 }
 0x4b5   : > { %4292 = vmatmul.mubr.msk.bf16.gmra.mrb[4].mxu1 %vm432_vm11, %v4729_v5 }
 0x4b6   : > { %3269 = vmatpush1.bf16.msra.mxu1 %v3240_v32  ;;  %3122 = vmatprep.mubr.bf16.mxu1 %v4756_v1  ;;  %v3421_v59 = vpop.permute.xlu1 %3420 }
 0x4b7   : > { %3270 = vmatprep.subr.bf16.mxu1 %v3243_v17  ;;  %v3423_v35 = vpop.permute.xlu0 %3422  ;;  %v4741_v17 = vld [vmem:[%s6292_s2 + $0xe8] sm:$0xff]  }
 0x4b8   : > { %v3435_v63 = vsel %vm6396_vm12, %v3421_v59, %v3423_v35  ;;  %vm6411_vm12 = vmmov %vm6408_vm8  ;;  %v4742_v35 = vld [vmem:[%s6292_s2 + $0xf0] sm:$0xff]  }
 0x4ba   : > { %3271 = vmatpush1.bf16.msra.mxu1 %v3242_v38  ;;  %v3419_v23 = vpop.permute.xlu1 %3418 }
 0x4bb   : > { %3458 = vmatprep.subr.bf16.mxu1 %v3431_v20  ;;  %v3427_v27 = vpop.permute.xlu0 %3426  ;;  %v3434_v26 = vsel %vm6397_vm14, %v3419_v23, %v3421_v59  ;;  %vm6412_vm14 = vmmov %vm6408_vm8  ;;  %v4744_v23 = vld [vmem:[%s6292_s2 + $0x100] sm:$0xff]  }
 0x4bd   : > { %4293 = vmatmul.mubr.msk.bf16.gmra.mrb[8].mxu1 %vm432_vm11, %v4730_v60 }
 0x4be   : > { %3132 = vmatprep.mubr.bf16.mxu1 %v4756_v1  ;;  %v3429_v30 = vpop.permute.xlu1 %3428 }
 0x4bf   : > { %v3425_v46 = vpop.permute.xlu0 %3424  ;;  %v3437_v28 = vsel %vm6398_vm15, %v3427_v27, %v3429_v30  ;;  %vm6413_vm15 = vmmov %vm6408_vm8  ;;  %v4747_v30 = vld [vmem:[%s6292_s2 + $0x118] sm:$0xff]  }
 0x4c0   : > { %v3436_v33 = vsel %vm6399_vm2, %v3425_v46, %v3427_v27  ;;  %vm6414_vm2 = vmmov %vm6408_vm8  ;;  %v4745_v27 = vld [vmem:[%s6292_s2 + $0x108] sm:$0xff]  }
 0x4c2   : > { %v3579_v49 = vpop.permute.xlu1 %3578 }
 0x4c3   : > { %v3581_v24 = vpop.permute.xlu0 %3580 }
 0x4c4   : > { %v3601_v58 = vsel %vm6400_vm4, %v3579_v49, %v3581_v24  ;;  %vm6415_vm4 = vmmov %vm6414_vm2 }
 0x4c5   : > { %4294 = vmatmul.mubr.msk.bf16.gmra.mrb[12].mxu1 %vm432_vm11, %v4731_v44  ;;  %v4743_v44 = vld [vmem:[%s6292_s2 + $0xf8] sm:$0xff]  }
 0x4c6   : > { %3296 = vmatprep.mubr.bf16.mxu1 %v4756_v1  ;;  %v3577_v31 = vpop.permute.xlu1 %3576 }
 0x4c7   : > { %v3585_v37 = vpop.permute.xlu0 %3584  ;;  %v3600_v51 = vsel %vm6401_vm13, %v3577_v31, %v3579_v49 }
 0x4ca   : > { %v3587_v62 = vpop.permute.xlu1 %3586 }
 0x4cb   : > { %v3583_v42 = vpop.permute.xlu0 %3582  ;;  %v3603_v7 = vsel %vm6402_vm1, %v3585_v37, %v3587_v62 }
 0x4cc   : > { %v3602_v8 = vsel %vm6403_vm0, %v3583_v42, %v3585_v37  ;;  %v3914_v37 = vld [vmem:[%s4834_s21 + $0x18] sm:$0xff] }
 0x4cd   : > { %4307 = vmatmul.mubr.msk.bf16.vlgmr.msra.gmra.mrb[0].mxu1 %vm432_vm11, %v4732_v34  ;;  %v4746_v34 = vld [vmem:[%s6292_s2 + $0x110] sm:$0xff]  }
 0x4ce   : > { %3459 = vmatpush1.bf16.msra.mxu1 %v3430_v45  ;;  %3306 = vmatprep.mubr.bf16.mxu1 %v4756_v1  ;;  %v3591_v41 = vpop.permute.xlu1 %3590 }
 0x4cf   : > { %3460 = vmatprep.subr.bf16.mxu1 %v3433_v54  ;;  %v3593_v47 = vpop.permute.xlu0 %3592  ;;  %v3911_v54 = vld [vmem:[%s4834_s21] sm:$0xff] }
 0x4d0   : > { %v3605_v11 = vsel %vm6404_vm3, %v3591_v41, %v3593_v47 }
 0x4d2   : > { %3461 = vmatpush1.bf16.msra.mxu1 %v3432_v19  ;;  %v3589_v48 = vpop.permute.xlu1 %3588 }
 0x4d3   : > { %3462 = vmatprep.subr.bf16.mxu1 %v3435_v63  ;;  %v3597_v3 = vpop.permute.xlu0 %3596  ;;  %v3604_v12 = vsel %vm6405_vm7, %v3589_v48, %v3591_v41 }
 0x4d5   : > { %4308 = vmatmul.mubr.msk.bf16.gmra.mrb[4].mxu1 %vm432_vm11, %v4733_v61  ;;  %v3912_v61 = vld [vmem:[%s4834_s21 + $0x8] sm:$0xff] }
 0x4d6   : > { %3463 = vmatpush1.bf16.msra.mxu1 %v3434_v26  ;;  %3316 = vmatprep.mubr.bf16.mxu1 %v4756_v1  ;;  %v3599_v52 = vpop.permute.xlu1 %3598 }
 0x4d7   : > { %3464 = vmatprep.subr.bf16.mxu1 %v3437_v28  ;;  %v3595_v50 = vpop.permute.xlu0 %3594  ;;  %v3607_v21 = vsel %vm6406_vm6, %v3597_v3, %v3599_v52  ;;  %v3913_v28 = vld [vmem:[%s4834_s21 + $0x10] sm:$0xff]  ;;  %v3915_v52 = vld [vmem:[%s4834_s21 + $0x20] sm:$0xff] }
 0x4d8   : > { %v3606_v55 = vsel %vm6407_vm5, %v3595_v50, %v3597_v3 }
 0x4da   : > { %3465 = vmatpush1.bf16.msra.mxu1 %v3436_v33  ;;  %v3773_v53 = vpop.permute.xlu1 %3772 }
 0x4db   : > { %3628 = vmatprep.subr.bf16.mxu1 %v3601_v58  ;;  %v3775_v22 = vpop.permute.xlu0 %3774 }
 0x4dc   : > { %v3795_v39 = vsel %vm6408_vm8, %v3773_v53, %v3775_v22 }
 0x4dd   : > { %4309 = vmatmul.mubr.msk.bf16.gmra.mrb[8].mxu1 %vm432_vm11, %v4734_v43 }
 0x4de   : > { %3326 = vmatprep.mubr.bf16.mxu1 %v4756_v1  ;;  %v3771_v9 = vpop.permute.xlu1 %3770 }
 0x4df   : > { %v3779_v25 = vpop.permute.xlu0 %3778  ;;  %v3794_v5 = vsel %vm6409_vm9, %v3771_v9, %v3773_v53 }
 0x4e2   : > { %v3781_v6 = vpop.permute.xlu1 %3780 }
 0x4e3   : > { %v3777_v14 = vpop.permute.xlu0 %3776  ;;  %v3797_v16 = vsel %vm6410_vm10, %v3779_v25, %v3781_v6 }
 0x4e4   : > { %v3796_v56 = vsel %vm6411_vm12, %v3777_v14, %v3779_v25  ;;  %v3918_v25 = vld [vmem:[%s4834_s21 + $0x38] sm:$0xff] }
 0x4e5   : > { %4310 = vmatmul.mubr.msk.bf16.gmra.mrb[12].mxu1 %vm432_vm11, %v4735_v57 }
 0x4e6   : > { %3490 = vmatprep.mubr.bf16.mxu1 %v4756_v1  ;;  %v3785_v15 = vpop.permute.xlu1 %3784 }
 0x4e7   : > { %v3787_v2 = vpop.permute.xlu0 %3786 }
 0x4e8   : > { %v3799_v38 = vsel %vm6412_vm14, %v3785_v15, %v3787_v2 }
 0x4ea   : > { %v3783_v40 = vpop.permute.xlu1 %3782 }
 0x4eb   : > { %v3791_v32 = vpop.permute.xlu0 %3790  ;;  %v3798_v60 = vsel %vm6413_vm15, %v3783_v40, %v3785_v15 }
 0x4ed   : > { %4323 = vmatmul.mubr.msk.bf16.vlgmr.msra.gmra.mrb[0].mxu1 %vm432_vm11, %v4736_v0 }
 0x4ee   : > { %3629 = vmatpush1.bf16.msra.mxu1 %v3600_v51  ;;  %3500 = vmatprep.mubr.bf16.mxu1 %v4756_v1  ;;  %v3793_v18 = vpop.permute.xlu1 %3792 }
 0x4ef   : > { %3630 = vmatprep.subr.bf16.mxu1 %v3603_v7  ;;  %v3789_v20 = vpop.permute.xlu0 %3788  ;;  %v3801_v36 = vsel %vm6414_vm2, %v3791_v32, %v3793_v18 }
 0x4f0   : > { %v3800_v59 = vsel %vm6415_vm4, %v3789_v20, %v3791_v32 }
 0x4f2   : > { %3631 = vmatpush1.bf16.msra.mxu1 %v3602_v8 }
 0x4f3   : > { %3632 = vmatprep.subr.bf16.mxu1 %v3605_v11  ;;  %v3916_v11 = vld [vmem:[%s4834_s21 + $0x28] sm:$0xff] }
 0x4f5   : > { %4324 = vmatmul.mubr.msk.bf16.gmra.mrb[4].mxu1 %vm432_vm11, %v4737_v10 }
 0x4f6   : > { %3633 = vmatpush1.bf16.msra.mxu1 %v3604_v12  ;;  %3510 = vmatprep.mubr.bf16.mxu1 %v4756_v1 }
 0x4f7   : > { %3634 = vmatprep.subr.bf16.mxu1 %v3607_v21 }
 0x4fa   : > { %3635 = vmatpush1.bf16.msra.mxu1 %v3606_v55  ;;  %v3917_v55 = vld [vmem:[%s4834_s21 + $0x30] sm:$0xff] }
 0x4fb   : > { %3822 = vmatprep.subr.bf16.mxu1 %v3795_v39 }
 0x4fd   : > { %4325 = vmatmul.mubr.msk.bf16.gmra.mrb[8].mxu1 %vm432_vm11, %v4738_v13 }
 0x4fe   : > { %3520 = vmatprep.mubr.bf16.mxu1 %v4756_v1 }
 0x4ff   : > { %v2225_v45 = vpop.permute.xlu1 %2224 }
 0x500   : > { %v2230_v63 = vpop.permute.xlu0 %2229 }
 0x503   : > { %v2235_v0 = vpop.permute.xlu1 %2234 }
 0x504   : > { %v2240_v12 = vpop.permute.xlu0 %2239 }
 0x505   : > { %4326 = vmatmul.mubr.msk.bf16.gmra.mrb[12].mxu1 %vm432_vm11, %v4739_v4 }
 0x506   : > { %3660 = vmatprep.mubr.bf16.mxu1 %v4756_v1 }
 0x50d   : > { %4339 = vmatmul.mubr.msk.bf16.vlgmr.msra.gmra.mrb[0].mxu1 %vm432_vm11, %v4740_v29 }
 0x50e   : > { %3823 = vmatpush1.bf16.msra.mxu1 %v3794_v5  ;;  %3670 = vmatprep.mubr.bf16.mxu1 %v4756_v1 }
 0x50f   : > { %3824 = vmatprep.subr.bf16.mxu1 %v3797_v16  ;;  %v2245_v16 = vpop.permute.xlu1 %2244 }
 0x512   : > { %3825 = vmatpush1.bf16.msra.mxu1 %v3796_v56 }
 0x513   : > { %3826 = vmatprep.subr.bf16.mxu1 %v3799_v38  ;;  %v3919_v38 = vld [vmem:[%s4834_s21 + $0x40] sm:$0xff] }
 0x515   : > { %4340 = vmatmul.mubr.msk.bf16.gmra.mrb[4].mxu1 %vm432_vm11, %v4741_v17 }
 0x516   : > { %3827 = vmatpush1.bf16.msra.mxu1 %v3798_v60  ;;  %3680 = vmatprep.mubr.bf16.mxu1 %v4756_v1 }
 0x517   : > { %3828 = vmatprep.subr.bf16.mxu1 %v3801_v36  ;;  %v3920_v36 = vld [vmem:[%s4834_s21 + $0x48] sm:$0xff] }
 0x51a   : > { %3829 = vmatpush1.bf16.msra.mxu1 %v3800_v59  ;;  %v2250_v59 = vpop.permute.xlu0 %2249 }
 0x51d   : > { %4341 = vmatmul.mubr.msk.bf16.gmra.mrb[8].mxu1 %vm432_vm11, %v4742_v35 }
 0x51e   : > { %3690 = vmatprep.mubr.bf16.mxu1 %v4756_v1 }
 0x525   : > { %4342 = vmatmul.mubr.msk.bf16.gmra.mrb[12].mxu1 %vm432_vm11, %v4743_v44 }
 0x526   : > { %3854 = vmatprep.mubr.bf16.mxu1 %v4756_v1 }
 0x52d   : > { %4355 = vmatmul.mubr.msk.bf16.vlgmr.msra.gmra.mrb[0].mxu1 %vm432_vm11, %v4744_v23 }
 0x52e   : > { %3864 = vmatprep.mubr.bf16.mxu1 %v4756_v1 }
 0x535   : > { %4356 = vmatmul.mubr.msk.bf16.gmra.mrb[4].mxu1 %vm432_vm11, %v4745_v27  ;;  %v3921_v27 = vld [vmem:[%s4834_s21 + $0x50] sm:$0xff] }
 0x536   : > { %3874 = vmatprep.mubr.bf16.mxu1 %v4756_v1 }
 0x53d   : > { %4357 = vmatmul.mubr.msk.bf16.gmra.mrb[8].mxu1 %vm432_vm11, %v4746_v34 }
 0x53e   : > { %3884 = vmatprep.mubr.bf16.mxu1 %v4756_v1 }
 0x545   : > { %4358 = vmatmul.mubr.msk.bf16.gmra.mrb[12].mxu1 %vm432_vm11, %v4747_v30 }
 0x600   : > { %v3856_v46 = vpop.f32.mrb[0].mxu1 }
 0x601   : > { %v4379_v19 = vadd.f32 %v3856_v46, %v2225_v45  ;;  %v3858_v49 = vpop.f32.mrb[1].mxu1  ;;  %v3922_v46 = vld [vmem:[%s4834_s21 + $0x58] sm:$0xff] }
 0x602   : > { %v4380_v24 = vadd.f32 %v3858_v49, %v2225_v45  ;;  %v3860_v26 = vpop.f32.mrb[2].mxu1 }
 0x603   : > { %v3927_v31 = vadd.f32 %v4379_v19, %v3911_v54  ;;  %v4381_v1 = vadd.f32 %v3860_v26, %v2230_v63  ;;  %v3862_v33 = vpop.f32.mrb[3].mxu1 }
 0x604   : > { %v3928_v43 = vadd.f32 %v4380_v24, %v3912_v61  ;;  %v4382_v58 = vadd.f32 %v3862_v33, %v2230_v63 }
 0x605   : > { %vm3943_vm11 = vcmp.ge.f32.partialorder %v3927_v31, 0.0  ;;  %v3959_v62 = vmul.f32 0.02, %v3927_v31  ;;  %v3929_v42 = vadd.f32 %v4381_v1, %v3913_v28 }
 0x606   : > { %vm3944_vm13 = vcmp.ge.f32.partialorder %v3928_v43, 0.0  ;;  %v3960_v57 = vmul.f32 0.02, %v3928_v43  ;;  %v3930_v41 = vadd.f32 %v4382_v58, %v3914_v37 }
 0x607   : > { %v3975_v47 = vsel %vm3943_vm11, %v3927_v31, %v3959_v62  ;;  %vm3945_vm1 = vcmp.ge.f32.partialorder %v3929_v42, 0.0  ;;  %v3961_v48 = vmul.f32 0.02, %v3929_v42  ;;  %v2255_v31 = vpop.permute.xlu1 %2254 }
 0x608   : > { %3991 = vst [vmem:[%s6257_s14] sm:$0xff] %v3975_v47  ;;  %v3976_v3 = vsel %vm3944_vm13, %v3928_v43, %v3960_v57  ;;  %vm3946_vm0 = vcmp.ge.f32.partialorder %v3930_v41, 0.0  ;;  %v3962_v51 = vmul.f32 0.02, %v3930_v41  ;;  %v3866_v7 = vpop.f32.mrb[4].mxu1  ;;  %v3923_v43 = vld [vmem:[%s4834_s21 + $0x60] sm:$0xff]  ;;  %v3924_v57 = vld [vmem:[%s4834_s21 + $0x68] sm:$0xff] }
 0x609   : > { %3992 = vst [vmem:[%s6257_s14 + $0x8] sm:$0xff] %v3976_v3  ;;  %v3977_v8 = vsel %vm3945_vm1, %v3929_v42, %v3961_v48  ;;  %v4383_v50 = vadd.f32 %v3866_v7, %v2235_v0  ;;  %v3868_v10 = vpop.f32.mrb[5].mxu1  ;;  %v3925_v3 = vld [vmem:[%s4834_s21 + $0x70] sm:$0xff] }
 0x60a   : > { %3993 = vst [vmem:[%s6257_s14 + $0x10] sm:$0xff] %v3977_v8  ;;  %v3978_v53 = vsel %vm3946_vm0, %v3930_v41, %v3962_v51  ;;  %v4384_v21 = vadd.f32 %v3868_v10, %v2235_v0  ;;  %v3870_v22 = vpop.f32.mrb[6].mxu1  ;;  %v2260_v41 = vpop.permute.xlu0 %2259  ;;  %v3926_v8 = vld [vmem:[%s4834_s21 + $0x78] sm:$0xff] }
 0x60b   : > { %3994 = vst [vmem:[%s6257_s14 + $0x18] sm:$0xff] %v3978_v53  ;;  %v3931_v13 = vadd.f32 %v4383_v50, %v3915_v52  ;;  %v4385_v39 = vadd.f32 %v3870_v22, %v2240_v12  ;;  %v3872_v9 = vpop.f32.mrb[7].mxu1 }
 0x60c   : > { %v3932_v6 = vadd.f32 %v4384_v21, %v3916_v11  ;;  %v4386_v4 = vadd.f32 %v3872_v9, %v2240_v12 }
 0x60d   : > { %vm3947_vm3 = vcmp.ge.f32.partialorder %v3931_v13, 0.0  ;;  %v3963_v14 = vmul.f32 0.02, %v3931_v13  ;;  %v3933_v15 = vadd.f32 %v4385_v39, %v3917_v55 }
 0x60e   : > { %vm3948_vm7 = vcmp.ge.f32.partialorder %v3932_v6, 0.0  ;;  %v3964_v29 = vmul.f32 0.02, %v3932_v6  ;;  %v3934_v2 = vadd.f32 %v4386_v4, %v3918_v25 }
 0x60f   : > { %v3979_v5 = vsel %vm3947_vm3, %v3931_v13, %v3963_v14  ;;  %vm3949_vm6 = vcmp.ge.f32.partialorder %v3933_v15, 0.0  ;;  %v3965_v40 = vmul.f32 0.02, %v3933_v15 }
 0x610   : > { %3995 = vst [vmem:[%s6257_s14 + $0x20] sm:$0xff] %v3979_v5  ;;  %v3980_v32 = vsel %vm3948_vm7, %v3932_v6, %v3964_v29  ;;  %vm3950_vm5 = vcmp.ge.f32.partialorder %v3934_v2, 0.0  ;;  %v3966_v56 = vmul.f32 0.02, %v3934_v2  ;;  %v3876_v17 = vpop.f32.mrb[8].mxu1 }
 0x611   : > { %3996 = vst [vmem:[%s6257_s14 + $0x28] sm:$0xff] %v3980_v32  ;;  %v3981_v18 = vsel %vm3949_vm6, %v3933_v15, %v3965_v40  ;;  %v4387_v60 = vadd.f32 %v3876_v17, %v2245_v16  ;;  %v3878_v20 = vpop.f32.mrb[9].mxu1 }
 0x612   : > { %3997 = vst [vmem:[%s6257_s14 + $0x30] sm:$0xff] %v3981_v18  ;;  %v3982_v35 = vsel %vm3950_vm5, %v3934_v2, %v3966_v56  ;;  %v4388_v44 = vadd.f32 %v3878_v20, %v2245_v16  ;;  %v3880_v23 = vpop.f32.mrb[10].mxu1 }
 0x613   : > { %3998 = vst [vmem:[%s6257_s14 + $0x38] sm:$0xff] %v3982_v35  ;;  %v3935_v34 = vadd.f32 %v4387_v60, %v3919_v38  ;;  %v4389_v30 = vadd.f32 %v3880_v23, %v2250_v59  ;;  %v3882_v45 = vpop.f32.mrb[11].mxu1 }
 0x614   : > { %v3936_v54 = vadd.f32 %v4388_v44, %v3920_v36  ;;  %v4390_v19 = vadd.f32 %v3882_v45, %v2250_v59 }
 0x615   : > { %vm3951_vm8 = vcmp.ge.f32.partialorder %v3935_v34, 0.0  ;;  %v3967_v49 = vmul.f32 0.02, %v3935_v34  ;;  %v3937_v61 = vadd.f32 %v4389_v30, %v3921_v27 }
 0x616   : > { %vm3952_vm9 = vcmp.ge.f32.partialorder %v3936_v54, 0.0  ;;  %v3968_v63 = vmul.f32 0.02, %v3936_v54  ;;  %v3938_v24 = vadd.f32 %v4390_v19, %v3922_v46 }
 0x617   : > { %v3983_v26 = vsel %vm3951_vm8, %v3935_v34, %v3967_v49  ;;  %vm3953_vm10 = vcmp.ge.f32.partialorder %v3937_v61, 0.0  ;;  %v3969_v28 = vmul.f32 0.02, %v3937_v61 }
 0x618   : > { %3999 = vst [vmem:[%s6257_s14 + $0x40] sm:$0xff] %v3983_v26  ;;  %v3984_v1 = vsel %vm3952_vm9, %v3936_v54, %v3968_v63  ;;  %vm3954_vm12 = vcmp.ge.f32.partialorder %v3938_v24, 0.0  ;;  %v3970_v33 = vmul.f32 0.02, %v3938_v24  ;;  %v3886_v37 = vpop.f32.mrb[12].mxu1 }
 0x619   : > { %4000 = vst [vmem:[%s6257_s14 + $0x48] sm:$0xff] %v3984_v1  ;;  %v3985_v58 = vsel %vm3953_vm10, %v3937_v61, %v3969_v28  ;;  %v4391_v62 = vadd.f32 %v3886_v37, %v2255_v31  ;;  %v3888_v42 = vpop.f32.mrb[13].mxu1 }
 0x61a   : > { %4001 = vst [vmem:[%s6257_s14 + $0x50] sm:$0xff] %v3985_v58  ;;  %v3986_v47 = vsel %vm3954_vm12, %v3938_v24, %v3970_v33  ;;  %v4392_v48 = vadd.f32 %v3888_v42, %v2255_v31  ;;  %v3890_v0 = vpop.f32.mrb[14].mxu1 }
 0x61b   : > { %4002 = vst [vmem:[%s6257_s14 + $0x58] sm:$0xff] %v3986_v47  ;;  %v3939_v51 = vadd.f32 %v4391_v62, %v3923_v43  ;;  %v4393_v7 = vadd.f32 %v3890_v0, %v2260_v41  ;;  %v3892_v52 = vpop.f32.mrb[15].mxu1 }
 0x61c   : > { %v3940_v50 = vadd.f32 %v4392_v48, %v3924_v57  ;;  %v4394_v10 = vadd.f32 %v3892_v52, %v2260_v41 }
 0x61d   : > { %vm3955_vm14 = vcmp.ge.f32.partialorder %v3939_v51, 0.0  ;;  %v3971_v11 = vmul.f32 0.02, %v3939_v51  ;;  %v3941_v12 = vadd.f32 %v4393_v7, %v3925_v3 }
 0x61e   : > { %vm3956_vm15 = vcmp.ge.f32.partialorder %v3940_v50, 0.0  ;;  %v3972_v53 = vmul.f32 0.02, %v3940_v50  ;;  %v3942_v21 = vadd.f32 %v4394_v10, %v3926_v8 }
 0x61f   : > { %v3987_v22 = vsel %vm3955_vm14, %v3939_v51, %v3971_v11  ;;  %vm3957_vm2 = vcmp.ge.f32.partialorder %v3941_v12, 0.0  ;;  %v3973_v55 = vmul.f32 0.02, %v3941_v12 }
 0x620   : > { %4003 = vst [vmem:[%s6257_s14 + $0x60] sm:$0xff] %v3987_v22  ;;  %v3988_v13 = vsel %vm3956_vm15, %v3940_v50, %v3972_v53  ;;  %vm3958_vm4 = vcmp.ge.f32.partialorder %v3942_v21, 0.0  ;;  %v3974_v39 = vmul.f32 0.02, %v3942_v21 }
 0x621   : > { %4004 = vst [vmem:[%s6257_s14 + $0x68] sm:$0xff] %v3988_v13  ;;  %v3989_v9 = vsel %vm3957_vm2, %v3941_v12, %v3973_v55 }
 0x622   : > { %4005 = vst [vmem:[%s6257_s14 + $0x70] sm:$0xff] %v3989_v9  ;;  %v3990_v25 = vsel %vm3958_vm4, %v3942_v21, %v3974_v39 }
 0x623   : > { %4006 = vst [vmem:[%s6257_s14 + $0x78] sm:$0xff] %v3990_v25 }
 0x624 PF: > { %s14_s15 = sadd.s32 1, %s4754_s15  }
 0x625   : > { %p11_p4 = scmp.ge.s32.totalorder %s14_s15, 4  }
 0x627   :  { %13 = sbr.rel (!%p11_p4) target bundleno = 1 (0x1), region = 83 }

</bundles_post_ra>
